<compile_context>
chip_gen: v7x
topology: tpu7x:2x2x1
jax: 0.10.0
libtpu: 0.0.40
codegen_flags: <defaults>
</compile_context>

<pallas_src>
import functools

import jax
import jax.numpy as jnp
from jax.experimental import pallas as pl
from jax.experimental.pallas import tpu as pltpu


# ------------------------------- small helpers -------------------------------
def _round_up(x, m):
    return -(-x // m) * m


def _vmem_capacity_bytes():
    try:
        return int(pltpu.get_tpu_info().vmem_capacity_bytes)
    except Exception:
        return 64 * 1024 * 1024   # conservative fallback: v7x per-TC VMEM


def _conv_step_vmem_bytes(TR, W, Cin, Cout, isz, pool):
    """Per-grid-step VMEM estimate: pipelined buffers + in-kernel temporaries."""
    Wp = _round_up(W, 8)
    out_rows = TR // 2 if pool else TR
    Wo = W // 2 if pool else W
    in_tile = TR * W * Cin * isz
    halo = 2 * W * Cin * isz
    w_bytes = 3 * 3 * Cin * Cout * isz
    out_tile = out_rows * Wo * Cout * isz
    slab_row = (TR + 2) * Wp * Cin * isz          # xr / xw sized temporaries
    slab = 3 * slab_row                           # p (K = 3*Cin lane-concat)
    acc = 2 * TR * Wp * Cout * 4                  # f32 accumulator + epilogue copy
    return (2 * in_tile + 2 * halo + 2 * w_bytes + 2 * out_tile
            + 2 * slab_row + slab + acc + (2 << 20))


def _choose_row_tile(H, W, Cin, Cout, isz, pool, budget):
    """Row tile: as fat as the VMEM budget allows; even when pool is fused.
    Does NOT need to divide H (grid uses cdiv + masked tail tile)."""
    step = 2 if pool else 1
    cap = 64 if Cin <= 64 else 32                 # fatter tiles for cheap layers
    cap = max(step, min(cap, _round_up(H, step)))
    n_rt = -(-H // cap)
    while True:
        TR = _round_up(-(-H // n_rt), step)
        if TR <= step or _conv_step_vmem_bytes(TR, W, Cin, Cout, isz, pool) <= budget:
            return max(TR, step)
        n_rt += 1


# ----------------------- Conv3x3 + ReLU (+ fused pool) -----------------------
def _conv3x3_relu_kernel(x_ref, top_ref, bot_ref, w_ref, b_ref, o_ref, *, pool, H):
    # x_ref:   (1, TR, W, Cin)   main row tile
    # top_ref: (1, 1, W, Cin)    row above the tile (clamped; zeroed at image top)
    # bot_ref: (1, 1, W, Cin)    row below the tile (clamped; zeroed at image bottom)
    # w_ref:   (3, 3*Cin, Cout)  per-kh weights, K laid out as kw*Cin + cin
    # b_ref:   (1, Cout)         f32 bias
    # o_ref:   (1, TR, W, Cout)  or (1, TR//2, W//2, Cout) if pool
    r = pl.program_id(1)
    n_rt = pl.num_programs(1)
    _, TR, W, Cin = x_ref.shape
    Cout = w_ref.shape[-1]
    Wp = _round_up(W, 8)

    x = x_ref[0]                                       # (TR, W, Cin)
    if H % TR != 0:
        # tail tile: zero rows past the image bottom (their block reads are garbage)
        row = jax.lax.broadcasted_iota(jnp.int32, (TR, 1, 1), 0)
        x = jnp.where(r * TR + row < H, x, jnp.zeros_like(x))

    tmask = (r > 0).astype(x.dtype)                    # zero halo at image top
    bmask = (r < n_rt - 1).astype(x.dtype)             # zero halo at image bottom
    top = top_ref[0] * tmask                           # (1, W, Cin)
    bot = bot_ref[0] * bmask                           # (1, W, Cin)
    xr = jnp.concatenate([top, x, bot], axis=0)        # (TR+2, W, Cin)

    # Pad width ONCE: 1 zero column on the left, Wp+1-W on the right.  The zero
    # columns double as the SAME-conv horizontal border padding, and Wp % 8 == 0
    # keeps the row merge / kh offsets below sublane-tile aligned.
    zl = jnp.zeros((TR + 2, 1, Cin), xr.dtype)
    zr = jnp.zeros((TR + 2, Wp + 1 - W, Cin), xr.dtype)
    xw = jnp.concatenate([zl, xr, zr], axis=1)         # (TR+2, Wp+2, Cin)

    # K = 3*Cin slab: one lane-concat of three column shifts (no left/right temps).
    p = jnp.concatenate([xw[:, 0:Wp], xw[:, 1:Wp + 1], xw[:, 2:Wp + 2]], axis=-1)
    p = p.reshape((TR + 2) * Wp, 3 * Cin)              # aligned merge (Wp % 8 == 0)

    # 3 fat MXU matmuls (one per kh whole-row offset), summed as values — no
    # scratch-ref read-modify-write through the single vst slot.
    M = TR * Wp
    acc = jnp.dot(p[0:M], w_ref[0], preferred_element_type=jnp.float32)
    acc = acc + jnp.dot(p[Wp:Wp + M], w_ref[1], preferred_element_type=jnp.float32)
    acc = acc + jnp.dot(p[2 * Wp:2 * Wp + M], w_ref[2],
                        preferred_element_type=jnp.float32)

    y = jnp.maximum(acc + b_ref[...], 0.0).reshape(TR, Wp, Cout)   # bias + ReLU (f32)
    if pool:
        # rows first via an outer-dim split (no relayout), then column pairs on
        # the half-size, lane-dense (.., Cout) result.
        y = jnp.max(y.reshape(TR // 2, 2, Wp, Cout), axis=1)       # (TR//2, Wp, Cout)
        y = jnp.max(y[:, :W, :].reshape(TR // 2, W // 2, 2, Cout), axis=2)
        o_ref[...] = y.reshape(1, TR // 2, W // 2, Cout).astype(o_ref.dtype)
    else:
        o_ref[...] = y[:, :W, :].reshape(1, TR, W, Cout).astype(o_ref.dtype)


def conv3x3_relu(x_nhwc, w_oihw, b, *, pool=False, compute_dtype=None):
    """3x3 conv (stride 1, SAME) + ReLU, optionally fused with MaxPool2x2."""
    N, H, W, Cin = x_nhwc.shape
    Cout = w_oihw.shape[0]
    cdt = compute_dtype if compute_dtype is not None else x_nhwc.dtype
    x = x_nhwc.astype(cdt)

    # OIHW -> (kh, kw*Cin + cin, Cout): matches the in-kernel K layout.
    w3 = jnp.transpose(w_oihw, (2, 3, 1, 0)).reshape(3, 3 * Cin, Cout).astype(cdt)
    b2 = b.reshape(1, Cout).astype(jnp.float32)

    if pool:
        assert H % 2 == 0 and W % 2 == 0, "fused pool needs even H, W"

    isz = jnp.dtype(cdt).itemsize
    vmem_cap = _vmem_capacity_bytes()
    budget = int(0.8 * vmem_cap)
    TR = _choose_row_tile(H, W, Cin, Cout, isz, pool, budget)
    n_rt = -(-H // TR)                               # cdiv: masked tail tile
    Ho, Wo = (H // 2, W // 2) if pool else (H, W)
    out_rows = TR // 2 if pool else TR

    vmem_need = _conv_step_vmem_bytes(TR, W, Cin, Cout, isz, pool)
    cp_kwargs = dict(dimension_semantics=("parallel", "parallel"))
    # v5e's default scoped VMEM is ~16 MiB; raise the limit when the working set
    # gets close, clamped to the chip's real capacity (64 MiB v7x, 128 MiB v5e/v6e).
    if vmem_need > 12 * 1024 * 1024:
        cp_kwargs["vmem_limit_bytes"] = int(
            min(max(vmem_need * 3 // 2, 32 * 1024 * 1024), int(0.85 * vmem_cap)))

    flops = 2 * N * H * W * 9 * Cin * Cout
    bytes_accessed = ((N * H * W * Cin + N * Ho * Wo * Cout) * isz
                      + w3.size * isz + b.size * 4)

    kernel = functools.partial(_conv3x3_relu_kernel, pool=pool, H=H)

    return pl.pallas_call(
        kernel,
        out_shape=jax.ShapeDtypeStruct((N, Ho, Wo, Cout), cdt),
        grid=(N, n_rt),
        in_specs=[
            pl.BlockSpec((1, TR, W, Cin), lambda n, r: (n, r, 0, 0)),
            pl.BlockSpec((1, 1, W, Cin),
                         lambda n, r: (n, jnp.maximum(r * TR - 1, 0), 0, 0)),
            pl.BlockSpec((1, 1, W, Cin),
                         lambda n, r: (n, jnp.minimum(r * TR + TR, H - 1), 0, 0)),
            # TODO(synk): pipeline_mode=pl.Buffered(1) on the two constant operands
            # below would reclaim one weight buffer on v7x; left at the default
            # double-buffering for compatibility.
            pl.BlockSpec((3, 3 * Cin, Cout), lambda n, r: (0, 0, 0)),
            pl.BlockSpec((1, Cout), lambda n, r: (0, 0)),
        ],
        out_specs=pl.BlockSpec((1, out_rows, Wo, Cout), lambda n, r: (n, r, 0, 0)),
        compiler_params=pltpu.CompilerParams(**cp_kwargs),
        cost_estimate=pl.CostEstimate(flops=flops, transcendentals=0,
                                      bytes_accessed=bytes_accessed),
    )(x, x, x, w3, b2)


def conv3x3_relu_xla(x_nhwc, w_oihw, b, *, compute_dtype=None):
    """Small-Cin stem conv (Cin=3): 3->128 lane padding makes Pallas a poor fit;
    XLA has a tuned path for few-channel inputs (perf review)."""
    cdt = compute_dtype if compute_dtype is not None else x_nhwc.dtype
    w_hwio = jnp.transpose(w_oihw, (2, 3, 1, 0)).astype(cdt)       # (3,3,Cin,Cout)
    y = jax.lax.conv_general_dilated(
        x_nhwc.astype(cdt), w_hwio, window_strides=(1, 1),
        padding=((1, 1), (1, 1)),
        dimension_numbers=('NHWC', 'HWIO', 'NHWC'),
        preferred_element_type=jnp.float32)
    y = jnp.maximum(y + b.reshape(1, 1, 1, -1).astype(jnp.float32), 0.0)
    return y.astype(cdt)


# --------------------- Standalone MaxPool 2x2 (fallback) ---------------------
def _maxpool2x2_kernel(x_ref, o_ref):
    _, TR, W, C = x_ref.shape
    x = jnp.max(x_ref[0].reshape(TR // 2, 2, W, C), axis=1)
    o_ref[...] = jnp.max(x.reshape(TR // 2, W // 2, 2, C),
                         axis=2).reshape(1, TR // 2, W // 2, C)


def maxpool2x2(x_nhwc):
    """Only used if an 'M' does not directly follow a Pallas conv (pool is fused
    otherwise).  Row-tiled so a full image never has to fit in VMEM."""
    N, H, W, C = x_nhwc.shape
    assert H % 2 == 0 and W % 2 == 0
    isz = jnp.dtype(x_nhwc.dtype).itemsize
    TR = max(2, min(32, H))
    TR -= TR % 2
    n_rt = -(-H // TR)
    return pl.pallas_call(
        _maxpool2x2_kernel,
        out_shape=jax.ShapeDtypeStruct((N, H // 2, W // 2, C), x_nhwc.dtype),
        grid=(N, n_rt),
        in_specs=[pl.BlockSpec((1, TR, W, C), lambda n, r: (n, r, 0, 0))],
        out_specs=pl.BlockSpec((1, TR // 2, W // 2, C), lambda n, r: (n, r, 0, 0)),
        compiler_params=pltpu.CompilerParams(
            dimension_semantics=("parallel", "parallel")),
        cost_estimate=pl.CostEstimate(
            flops=N * H * W * C, transcendentals=0,
            bytes_accessed=(N * H * W * C + N * (H // 2) * (W // 2) * C) * isz),
    )(x_nhwc)


# --------------------------------- Vgg model ---------------------------------
def init_vgg_params(cfg, key):
    """Deterministic parameter init (torch Conv2d shapes: OIHW weight, (O,) bias)."""
    params = []
    in_c = 3
    for v in cfg:
        if v == 'M':
            continue
        key, kw, kb = jax.random.split(key, 3)
        fan_in = in_c * 3 * 3
        bound = 1.0 / (fan_in ** 0.5)
        w = jax.random.uniform(kw, (v, in_c, 3, 3), jnp.float32, -bound, bound)
        b = jax.random.uniform(kb, (v,), jnp.float32, -bound, bound)
        params.append((w, b))
        in_c = v
    return params


def vgg_forward(x_nchw, cfg, params, *, compute_dtype=jnp.bfloat16,
                first_layer_xla=True):
    """Vgg.forward (batch_norm=False): Conv3x3(pad=1)+ReLU / MaxPool2x2 stack."""
    # TODO(synk): batch_norm=True branch (BatchNorm2d) not implemented; the
    # reference default (batch_norm=False) is reproduced exactly.
    x = jnp.transpose(x_nchw, (0, 2, 3, 1))          # NCHW -> NHWC (channels on lanes)
    pi = 0
    i = 0
    while i < len(cfg):
        v = cfg[i]
        if v == 'M':
            x = maxpool2x2(x)
            i += 1
        else:
            w, b = params[pi]
            pi += 1
            if first_layer_xla and w.shape[1] <= 4:
                x = conv3x3_relu_xla(x, w, b, compute_dtype=compute_dtype)
                i += 1
            else:
                fuse_pool = (i + 1 < len(cfg) and cfg[i + 1] == 'M')
                x = conv3x3_relu(x, w, b, pool=fuse_pool,
                                 compute_dtype=compute_dtype)
                i += 2 if fuse_pool else 1
    x = x.astype(x_nchw.dtype)
    return jnp.transpose(x, (0, 3, 1, 2))            # NHWC -> NCHW


# ----------------------------- pure-JAX reference ----------------------------
def vgg_reference(x_nchw, cfg, params):
    x = x_nchw
    pi = 0
    for v in cfg:
        if v == 'M':
            x = jax.lax.reduce_window(x, -jnp.inf, jax.lax.max,
                                      (1, 1, 2, 2), (1, 1, 2, 2), 'VALID')
        else:
            w, b = params[pi]
            pi += 1
            x = jax.lax.conv_general_dilated(
                x, w, window_strides=(1, 1), padding=((1, 1), (1, 1)),
                dimension_numbers=('NCHW', 'OIHW', 'NCHW'))
            x = jax.nn.relu(x + b.reshape(1, -1, 1, 1))
    return x


if __name__ == "__main__":
    cfg = [8, 8, 'M', 16, 'M']          # small VGG-style config
    key = jax.random.PRNGKey(0)
    key, xk = jax.random.split(key)
    x = jax.random.normal(xk, (2, 3, 16, 16), jnp.float32)   # NCHW, in_channels=3

    params = init_vgg_params(cfg, key)
    ref = vgg_reference(x, cfg, params)

    # f32 compute path (exact reference comparison)
    out = vgg_forward(x, cfg, params, compute_dtype=jnp.float32)
    out = jax.block_until_ready(out)
    assert out.shape == ref.shape == (2, 16, 4, 4), (out.shape, ref.shape)
    assert jnp.allclose(out, ref, atol=1e-4, rtol=1e-4), "mismatch vs reference"

    # default bf16 compute path (MXU-friendly; f32 accumulation in-kernel)
    out_bf16 = jax.block_until_ready(vgg_forward(x, cfg, params))
    assert out_bf16.shape == ref.shape
    assert float(jnp.max(jnp.abs(out_bf16.astype(jnp.float32) - ref))) < 0.25

    print("KERNEL_OK")
</pallas_src>

<mosaic_0001>
module attributes {stable_mosaic.version = 11 : i64} {
  func.func @_conv3x3_relu_kernel(%arg0: i32, %arg1: i32, %arg2: memref<1x16x16x8xf32, #tpu.memory_space<vmem>>, %arg3: memref<1x1x16x8xf32, #tpu.memory_space<vmem>>, %arg4: memref<1x1x16x8xf32, #tpu.memory_space<vmem>>, %arg5: memref<3x24x8xf32, #tpu.memory_space<vmem>>, %arg6: memref<1x8xf32, #tpu.memory_space<vmem>>, %arg7: memref<1x8x8x8xf32, #tpu.memory_space<vmem>>) attributes {dimension_semantics = [#tpu.dimension_semantics<parallel>, #tpu.dimension_semantics<parallel>], iteration_bounds = array<i64: 2, 1>, scalar_prefetch = 0 : i64, scratch_operands = 0 : i64, tpu.core_type = #tpu.core_type<tc>, window_params = [{transform_indices = @transform_0, window_bounds = array<i64: 1, 16, 16, 8>}, {transform_indices = @transform_1, window_bounds = array<i64: 1, 1, 16, 8>}, {transform_indices = @transform_2, window_bounds = array<i64: 1, 1, 16, 8>}, {pipeline_mode = #tpu.pipeline_mode<synchronous>, transform_indices = @transform_3, window_bounds = array<i64: 3, 24, 8>}, {pipeline_mode = #tpu.pipeline_mode<synchronous>, transform_indices = @transform_4, window_bounds = array<i64: 1, 8>}, {transform_indices = @transform_5, window_bounds = array<i64: 1, 8, 8, 8>}]} {
    %c0 = arith.constant 0 : index
    %c0_0 = arith.constant 0 : index
    %c0_1 = arith.constant 0 : index
    %c0_2 = arith.constant 0 : index
    %0 = vector.load %arg2[%c0, %c0_0, %c0_1, %c0_2] : memref<1x16x16x8xf32, #tpu.memory_space<vmem>>, vector<1x16x16x8xf32>
    %1 = vector.shape_cast %0 : vector<1x16x16x8xf32> to vector<16x16x8xf32>
    %c0_i32 = arith.constant 0 : i32
    %2 = arith.cmpi sgt, %arg1, %c0_i32 : i32
    %3 = arith.extui %2 : i1 to i32
    %4 = arith.sitofp %3 : i32 to f32
    %c0_i32_3 = arith.constant 0 : i32
    %5 = arith.cmpi slt, %arg1, %c0_i32_3 : i32
    %6 = arith.extui %5 : i1 to i32
    %7 = arith.sitofp %6 : i32 to f32
    %c0_4 = arith.constant 0 : index
    %c0_5 = arith.constant 0 : index
    %c0_6 = arith.constant 0 : index
    %c0_7 = arith.constant 0 : index
    %8 = vector.load %arg3[%c0_4, %c0_5, %c0_6, %c0_7] : memref<1x1x16x8xf32, #tpu.memory_space<vmem>>, vector<1x1x16x8xf32>
    %9 = vector.shape_cast %8 : vector<1x1x16x8xf32> to vector<1x16x8xf32>
    %10 = vector.broadcast %4 : f32 to vector<1x16x8xf32>
    %11 = arith.mulf %9, %10 : vector<1x16x8xf32>
    %c0_8 = arith.constant 0 : index
    %c0_9 = arith.constant 0 : index
    %c0_10 = arith.constant 0 : index
    %c0_11 = arith.constant 0 : index
    %12 = vector.load %arg4[%c0_8, %c0_9, %c0_10, %c0_11] : memref<1x1x16x8xf32, #tpu.memory_space<vmem>>, vector<1x1x16x8xf32>
    %13 = vector.shape_cast %12 : vector<1x1x16x8xf32> to vector<1x16x8xf32>
    %14 = vector.broadcast %7 : f32 to vector<1x16x8xf32>
    %15 = arith.mulf %13, %14 : vector<1x16x8xf32>
    %16 = tpu.concatenate %11, %1, %15 in 0 : vector<1x16x8xf32>, vector<16x16x8xf32>, vector<1x16x8xf32> -> vector<18x16x8xf32>
    %cst = arith.constant 0.000000e+00 : f32
    %17 = vector.broadcast %cst : f32 to vector<18x1x8xf32>
    %cst_12 = arith.constant 0.000000e+00 : f32
    %18 = vector.broadcast %cst_12 : f32 to vector<18x1x8xf32>
    %19 = tpu.concatenate %17, %16, %18 in 1 : vector<18x1x8xf32>, vector<18x16x8xf32>, vector<18x1x8xf32> -> vector<18x18x8xf32>
    %20 = vector.extract_strided_slice %19 {offsets = [0, 0, 0], sizes = [18, 16, 8], strides = [1, 1, 1]} : vector<18x18x8xf32> to vector<18x16x8xf32>
    %21 = vector.extract_strided_slice %19 {offsets = [0, 1, 0], sizes = [18, 16, 8], strides = [1, 1, 1]} : vector<18x18x8xf32> to vector<18x16x8xf32>
    %22 = vector.extract_strided_slice %19 {offsets = [0, 2, 0], sizes = [18, 16, 8], strides = [1, 1, 1]} : vector<18x18x8xf32> to vector<18x16x8xf32>
    %23 = tpu.concatenate %20, %21, %22 in 2 : vector<18x16x8xf32>, vector<18x16x8xf32>, vector<18x16x8xf32> -> vector<18x16x24xf32>
    %24 = vector.shape_cast %23 : vector<18x16x24xf32> to vector<288x24xf32>
    %25 = vector.extract_strided_slice %24 {offsets = [0, 0], sizes = [256, 24], strides = [1, 1]} : vector<288x24xf32> to vector<256x24xf32>
    %c0_13 = arith.constant 0 : index
    %c0_14 = arith.constant 0 : index
    %c0_15 = arith.constant 0 : index
    %26 = vector.load %arg5[%c0_13, %c0_14, %c0_15] : memref<3x24x8xf32, #tpu.memory_space<vmem>>, vector<1x24x8xf32>
    %27 = vector.shape_cast %26 : vector<1x24x8xf32> to vector<24x8xf32>
    %cst_16 = arith.constant dense<0.000000e+00> : vector<256x8xf32>
    %28 = tpu.matmul %25, %27, %cst_16 {dimension_numbers = #tpu.dot_dimension_numbers<[1], [0], [0], [1], [0, 0, 1, 1], [], []>} : vector<256x24xf32>, vector<24x8xf32>, vector<256x8xf32> -> vector<256x8xf32>
    %29 = vector.extract_strided_slice %24 {offsets = [16, 0], sizes = [256, 24], strides = [1, 1]} : vector<288x24xf32> to vector<256x24xf32>
    %c1 = arith.constant 1 : index
    %c0_17 = arith.constant 0 : index
    %c0_18 = arith.constant 0 : index
    %30 = vector.load %arg5[%c1, %c0_17, %c0_18] : memref<3x24x8xf32, #tpu.memory_space<vmem>>, vector<1x24x8xf32>
    %31 = vector.shape_cast %30 : vector<1x24x8xf32> to vector<24x8xf32>
    %cst_19 = arith.constant dense<0.000000e+00> : vector<256x8xf32>
    %32 = tpu.matmul %29, %31, %cst_19 {dimension_numbers = #tpu.dot_dimension_numbers<[1], [0], [0], [1], [0, 0, 1, 1], [], []>} : vector<256x24xf32>, vector<24x8xf32>, vector<256x8xf32> -> vector<256x8xf32>
    %33 = arith.addf %28, %32 : vector<256x8xf32>
    %34 = vector.extract_strided_slice %24 {offsets = [32, 0], sizes = [256, 24], strides = [1, 1]} : vector<288x24xf32> to vector<256x24xf32>
    %c2 = arith.constant 2 : index
    %c0_20 = arith.constant 0 : index
    %c0_21 = arith.constant 0 : index
    %35 = vector.load %arg5[%c2, %c0_20, %c0_21] : memref<3x24x8xf32, #tpu.memory_space<vmem>>, vector<1x24x8xf32>
    %36 = vector.shape_cast %35 : vector<1x24x8xf32> to vector<24x8xf32>
    %cst_22 = arith.constant dense<0.000000e+00> : vector<256x8xf32>
    %37 = tpu.matmul %34, %36, %cst_22 {dimension_numbers = #tpu.dot_dimension_numbers<[1], [0], [0], [1], [0, 0, 1, 1], [], []>} : vector<256x24xf32>, vector<24x8xf32>, vector<256x8xf32> -> vector<256x8xf32>
    %38 = arith.addf %33, %37 : vector<256x8xf32>
    %c0_23 = arith.constant 0 : index
    %c0_24 = arith.constant 0 : index
    %39 = vector.load %arg6[%c0_23, %c0_24] : memref<1x8xf32, #tpu.memory_space<vmem>>, vector<1x8xf32>
    %40 = vector.broadcast %39 : vector<1x8xf32> to vector<256x8xf32>
    %41 = arith.addf %38, %40 : vector<256x8xf32>
    %cst_25 = arith.constant 0.000000e+00 : f32
    %42 = vector.broadcast %cst_25 : f32 to vector<256x8xf32>
    %43 = arith.maximumf %41, %42 : vector<256x8xf32>
    %44 = vector.shape_cast %43 : vector<256x8xf32> to vector<16x16x8xf32>
    %45 = vector.shape_cast %44 : vector<16x16x8xf32> to vector<8x2x16x8xf32>
    %cst_26 = arith.constant dense<0xFF800000> : vector<8x16x8xf32>
    %46 = vector.multi_reduction <maximumf>, %45, %cst_26 [1] : vector<8x2x16x8xf32> to vector<8x16x8xf32>
    %47 = vector.shape_cast %46 : vector<8x16x8xf32> to vector<8x8x2x8xf32>
    %cst_27 = arith.constant dense<0xFF800000> : vector<8x8x8xf32>
    %48 = vector.multi_reduction <maximumf>, %47, %cst_27 [2] : vector<8x8x2x8xf32> to vector<8x8x8xf32>
    %49 = vector.shape_cast %48 : vector<8x8x8xf32> to vector<1x8x8x8xf32>
    %c0_28 = arith.constant 0 : index
    %c0_29 = arith.constant 0 : index
    %c0_30 = arith.constant 0 : index
    %c0_31 = arith.constant 0 : index
    %50 = vector.load %arg7[%c0_28, %c0_29, %c0_30, %c0_31] : memref<1x8x8x8xf32, #tpu.memory_space<vmem>>, vector<1x8x8x8xf32>
    tpu.vector_store %arg7[%c0_28, %c0_29, %c0_30, %c0_31], %49 {strides = array<i32>} : memref<1x8x8x8xf32, #tpu.memory_space<vmem>>, vector<1x8x8x8xf32>,
    return
  }
  func.func @transform_0(%arg0: i32, %arg1: i32) -> (i32, i32, i32, i32) {
    %c0_i32 = arith.constant 0 : i32
    %c0_i32_0 = arith.constant 0 : i32
    %c0_i32_1 = arith.constant 0 : i32
    return %arg0, %arg1, %c0_i32, %c0_i32_0 : i32, i32, i32, i32
  }
  func.func @transform_1(%arg0: i32, %arg1: i32) -> (i32, i32, i32, i32) {
    %c16_i32 = arith.constant 16 : i32
    %0 = arith.muli %arg1, %c16_i32 : i32
    %c1_i32 = arith.constant 1 : i32
    %1 = arith.subi %0, %c1_i32 : i32
    %c0_i32 = arith.constant 0 : i32
    %2 = arith.maxsi %1, %c0_i32 : i32
    %c0_i32_0 = arith.constant 0 : i32
    %c0_i32_1 = arith.constant 0 : i32
    %c0_i32_2 = arith.constant 0 : i32
    return %arg0, %2, %c0_i32_0, %c0_i32_1 : i32, i32, i32, i32
  }
  func.func @transform_2(%arg0: i32, %arg1: i32) -> (i32, i32, i32, i32) {
    %c16_i32 = arith.constant 16 : i32
    %0 = arith.muli %arg1, %c16_i32 : i32
    %c16_i32_0 = arith.constant 16 : i32
    %1 = arith.addi %0, %c16_i32_0 : i32
    %c15_i32 = arith.constant 15 : i32
    %2 = arith.minsi %1, %c15_i32 : i32
    %c0_i32 = arith.constant 0 : i32
    %c0_i32_1 = arith.constant 0 : i32
    %c0_i32_2 = arith.constant 0 : i32
    return %arg0, %2, %c0_i32, %c0_i32_1 : i32, i32, i32, i32
  }
  func.func @transform_3(%arg0: i32, %arg1: i32) -> (i32, i32, i32) {
    %c0_i32 = arith.constant 0 : i32
    %c0_i32_0 = arith.constant 0 : i32
    %c0_i32_1 = arith.constant 0 : i32
    %c0_i32_2 = arith.constant 0 : i32
    return %c0_i32, %c0_i32_0, %c0_i32_1 : i32, i32, i32
  }
  func.func @transform_4(%arg0: i32, %arg1: i32) -> (i32, i32) {
    %c0_i32 = arith.constant 0 : i32
    %c0_i32_0 = arith.constant 0 : i32
    %c0_i32_1 = arith.constant 0 : i32
    return %c0_i32, %c0_i32_0 : i32, i32
  }
  func.func @transform_5(%arg0: i32, %arg1: i32) -> (i32, i32, i32, i32) {
    %c0_i32 = arith.constant 0 : i32
    %c0_i32_0 = arith.constant 0 : i32
    %c0_i32_1 = arith.constant 0 : i32
    return %arg0, %arg1, %c0_i32, %c0_i32_0 : i32, i32, i32, i32
  }
}

</mosaic_0001>

<bundles_post_ra>
// kernel: tpu_custom_call.1
= control target key start
LH: loop header
LB: loop body
LE: loop exit
PB: predicated region body
PF: predicated region fallthrough
CT: control target
= control target key end

     0   :  { %10 = vsyncpa [#allocation3], 0  ;;  %s5060_s0 = inlined_call_operand.vmem [shape: f32[2,16,16,8], index: 0, kind: input, shape index: {}]   ;;  %s5061_s1 = inlined_call_operand.vmem [shape: f32[2,16,16,8], index: 1, kind: input, shape index: {}]   ;;  %s5062_s2 = inlined_call_operand.vmem [shape: f32[2,16,16,8], index: 2, kind: input, shape index: {}]   ;;  %s5063_s3 = inlined_call_operand.vmem [shape: f32[3,24,8], index: 3, kind: input, shape index: {}]   ;;  %s5064_s4 = inlined_call_operand.vmem [shape: f32[1,8], index: 4, kind: input, shape index: {}]   ;;  %s5065_s5 = inlined_call_operand.hbm [shape: f32[2,8,8,8], index: 5, kind: output, shape index: {}]  }
   0x1   :  { %12 = vsyncpa [#allocation3 + $0x1], 0  ;;  %s3796_s18 = smov 0   ;;  %s3798_s19 = smov 0  }
   0x2   :  { %s3800_s20 = smov 0   ;;  %s3802_s21 = smov 0  }
   0x3   :  { %s3804_s22 = smov 0   ;;  %s3806_s23 = smov 0  }
   0x4 LB: > { %s3148_s24 = sadd.s32 4294967295, %s3759_s23   ;;  %s3149_s25 = sadd.s32 4294967294, %s3759_s23   ;;  %s3759_s23 = sphi %s3806_s23, %s18_s23   ;;  %s3755_s22 = sphi %s3804_s22, %s5072_s22   ;;  %s3751_s21 = sphi %s3802_s21, %s5071_s21   ;;  %s3747_s20 = sphi %s3800_s20, %s5070_s20   ;;  %s3743_s19 = sphi %s3798_s19, %s5069_s19   ;;  %s3739_s18 = sphi %s3796_s18, %s5068_s18  }
   0x5   : > { %s30_s26 = sadd.s32 1, %s3755_s22  ;;  %s181_s27 = sadd.s32 1, %s3747_s20 }
   0x6   : > { %p32_p0 = scmp.ge.s32.totalorder %s30_s26, 2  ;;  %p191_p1 = scmp.ne.s32.totalorder %s3747_s20, %s3743_s19 }
   0x7   : > { %p192_p2 = scmp.eq.s32.totalorder %s3148_s24, 1  ;;  %p197_p3 = scmp.ne.s32.totalorder %s3743_s19, %s3739_s18 }
   0x8   : > { %s5074_s26 = smov (%p32_p0, %s30_s26), 0  ;;  %p198_p5 = scmp.eq.s32.totalorder %s3149_s25, 1 }
   0x9   : > { %p3836_p4 = por %p192_p2, %p191_p1  ;;  %s176_s29 = ssub.s32 %s3755_s22, %s5074_s26 }
   0xa   : > { %p3152_p6 = scmp.ge.s32.totalorder %s3759_s23, 1  ;;  %p179_p7 = scmp.eq.s32.totalorder %s176_s29, 0 }
   0xb   : > { %p3843_p8 = por %p198_p5, %p197_p3  ;;  %p276_p9 = scmp.lt.s32.totalorder %s3759_s23, 3 }
   0xc   : > { %s3849_s6 = scalar_select %p179_p7, %s3747_s20, %s181_s27  }
   0xd   : > { %p277_p10 = pnand %p3152_p6, %p276_p9 }
   0xe   : > { %p336_p11 = scmp.lt.s32.totalorder (!%p277_p10), %s3751_s21, 1  ;;  %v3160_v0 = vld [vmem:[%s5063_s3 + $0x18] sm:$0xff] (!%p277_p10)  ;;  %v3161_v1 = vld [vmem:[%s5063_s3 + $0x20] sm:$0xff] (!%p277_p10)  ;;  %vm465_vm0 = vcmask (!%p277_p10), 1040384   ;;  %vm646_vm1 = vcmask (!%p277_p10), 1046528   ;;  %vm845_vm2 = vcmask (!%p277_p10), 1045504  }
   0xf   : > { %280 = sbr.rel (%p277_p10) target bundleno = 638 (0x27e), region = 40  ;;  %v3541_v2 = vpack.c.bf16 (!%p277_p10), %v3161_v1, %v3160_v0  ;;  %s3761_s25 = smov (!%p277_p10), 8   ;;  %v3162_v42 = vld [vmem:[%s5063_s3 + $0x28] sm:$0xff] (!%p277_p10)  ;;  %vm1044_vm3 = vcmask (!%p277_p10), 64512   ;;  %vm1081_vm4 = vcmask (!%p277_p10), 130048   ;;  %vm1125_vm5 = vcmask (!%p277_p10), 195584  }
  0x10   : > { %s3762_s27 = smov (!%p277_p10), 16   ;;  %vm2416_vm6 = vcmask (!%p277_p10), 58368   ;;  %vm2929_vm7 = vcmask (!%p277_p10), 1041409   ;;  %vm2931_vm8 = vcmask (!%p277_p10), 1042434   ;;  %vm2933_vm9 = vcmask (!%p277_p10), 1043459   ;;  %s332_s13 = sand.u32 (!%p277_p10), 1, %s3743_s19  }
  0x11   : > { %3542 = vmatprep.subr.bf16.mxu1 (!%p277_p10), %v3541_v2  ;;  %vm2935_vm10 = vcmask (!%p277_p10), 1044484   ;;  %vm2937_vm11 = vcmask (!%p277_p10), 1045509   ;;  %vm2939_vm12 = vcmask (!%p277_p10), 1046534   ;;  %vm2941_vm13 = vcmask (!%p277_p10), 1047559   ;;  %s3153_s14 = sshll.u32 (!%p277_p10), %s332_s13, 6  ;;  %s3272_s29 = sshll.u32 (!%p277_p10), %s3751_s21, 10 }
  0x12   : > { %3544 = vmatpush3.bf16.msra.mxu1 (!%p277_p10), %v3541_v2  ;;  %s4679_s16 = scalar_lea.vmem (!%p277_p10), [#allocation2], %s3153_s14  ;;  %s3764_s10 = smov (!%p277_p10), [#allocation2]  }
  0x13   : > { %3383 = vmatprep.subr.mxu1 (!%p277_p10), %v3162_v42 }
  0x16   : > { %s337_s11 = scalar_select %p336_p11, %s3751_s21, 1  ;;  %3384 = vmatpush3.msra.mxu1 %v3162_v42 }
  0x17   : > { %s5013_s21 = scalar_lea.sflag [#allocation3], %s332_s13 }
  0x18   : > { %s3859_s12 = sshll.u32 %s337_s11, 8 }
  0x19   : > { %s3865_s15 = scalar_lea.vmem %s5060_s0, %s3859_s12  ;;  %s358_s24 = scalar_lea.vmem %s5061_s1, %s3859_s12 }
  0x1a   : > { %v381_v3 = vld [vmem:[%s3865_s15] sm:$0xff]  ;;  %v382_v4 = vld [vmem:[%s3865_s15 + $0x8] sm:$0xff]  ;;  %v383_v25 = vld [vmem:[%s3865_s15 + $0x10] sm:$0xff]  ;;  %s3271_s7 = sadd.s32 240, %s3859_s12 }
  0x1b   : > { %v419_v5 = vld [vmem:[%s358_s24] sm:$0xff]  ;;  %v469_v6 = vrot.slane %v381_v3, 7  ;;  %v470_v7 = vrot.slane %v382_v4, 7  ;;  %v420_v8 = vld [vmem:[%s358_s24 + $0x8] sm:$0xff]  ;;  %v384_v26 = vld [vmem:[%s3865_s15 + $0x18] sm:$0xff]  ;;  %v472_v34 = vrot.slane %v383_v25, 7  ;;  %s375_s12 = scalar_lea.vmem %s5062_s2, %s3271_s7 }
  0x1c   : > { %v422_v9 = vmul.f32 0.0, %v419_v5  ;;  %v423_v10 = vmul.f32 0.0, %v420_v8  ;;  %v473_v35 = vrot.slane %v384_v26, 7  ;;  %v385_v41 = vld [vmem:[%s3865_s15 + $0x20] sm:$0xff]  ;;  %v386_v46 = vld [vmem:[%s3865_s15 + $0x28] sm:$0xff]  ;;  %v387_v62 = vld [vmem:[%s3865_s15 + $0x30] sm:$0xff] }
  0x1d   : > { %v3874_v11 = vsel %vm465_vm0, %v469_v6, %v470_v7  ;;  %v593_v12 = vsel %vm465_vm0, %v470_v7, 0.0  ;;  %v3878_v13 = vsel %vm465_vm0, 0.0, %v469_v6  ;;  %v3916_v45 = vsel %vm465_vm0, 0.0, %v472_v34  ;;  %v388_v63 = vld [vmem:[%s3865_s15 + $0x38] sm:$0xff]  ;;  %s3024_s7 = sshll.u32 %s4679_s16, 4  ;;  %s5006_s7 = int_to_ptr.vmem [resolvable:$true] %s3024_s7 }
  0x1e   : > { %v466_v14 = vrot.slane %v422_v9, 7  ;;  %v653_v15 = vrot.slane %v3874_v11, 1  ;;  %v655_v16 = vrot.slane %v593_v12, 1  ;;  %v652_v17 = vrot.slane %v3878_v13, 1  ;;  %s3681_s9 = scalar_lea.vmem %s5006_s7, 1024 }
  0x1f   : > { %v851_v18 = vrot.slane %v3878_v13, 2  ;;  %v852_v19 = vrot.slane %v3874_v11, 2  ;;  %v467_v20 = vrot.slane %v423_v10, 7  ;;  %v854_v28 = vrot.slane %v593_v12, 2  ;;  %p3682_p12 = scmp.ne.s32.totalorder %s5006_s7, %s3681_s9 }
  0x20   : > { %v3885_v21 = vsel %vm465_vm0, 0.0, %v466_v14  ;;  %v656_v22 = vsel %vm646_vm1, %v653_v15, %v655_v16  ;;  %v654_v23 = vsel %vm646_vm1, %v652_v17, %v653_v15  ;;  %v3912_v43 = vsel %vm465_vm0, %v472_v34, %v473_v35  ;;  %v390_v15 = vld [vmem:[%s3865_s15 + $0x48] sm:$0xff] }
  0x21   : > { %v647_v24 = vrot.slane %v3885_v21, 1  ;;  %743 = vrot.lane.b32.xlu1 %v656_v22, %s3761_s25  ;;  %741 = vrot.lane.b32.xlu0 %v654_v23, %s3761_s25  ;;  %v3895_v27 = vsel %vm465_vm0, %v466_v14, %v467_v20  ;;  %v846_v29 = vrot.slane %v3885_v21, 2  ;;  %v853_v30 = vsel %vm845_vm2, %v851_v18, %v852_v19  ;;  %v389_v14 = vld [vmem:[%s3865_s15 + $0x40] sm:$0xff]  ;;  %p3683_p13 = pnand %p3682_p12, %p3836_p4 }
  0x22   : > { %v648_v31 = vrot.slane %v3895_v27, 1  ;;  %v847_v32 = vrot.slane %v3895_v27, 2  ;;  %v592_v33 = vsel %vm465_vm0, %v467_v20, 0.0  ;;  %v855_v38 = vsel %vm845_vm2, %v852_v19, %v854_v28 }
  0x23   : > { %v650_v37 = vrot.slane %v592_v33, 1  ;;  %v849_v40 = vrot.slane %v592_v33, 2  ;;  %v594_v44 = vsel %vm465_vm0, %v473_v35, 0.0  ;;  %v475_v48 = vrot.slane %v385_v41, 7  ;;  %p3684_p0 = pneg %p3683_p13 }
  0x24   : > { %v649_v36 = vsel %vm646_vm1, %v647_v24, %v648_v31  ;;  %v848_v39 = vsel %vm845_vm2, %v846_v29, %v847_v32  ;;  %v658_v50 = vrot.slane %v3912_v43, 1  ;;  %v660_v51 = vrot.slane %v594_v44, 1 }
  0x25   : > { %940 = vrot.lane.b32.xlu1 %v853_v30, %s3762_s27  ;;  %737 = vrot.lane.b32.xlu0 %v649_v36, %s3761_s25  ;;  %v651_v47 = vsel %vm646_vm1, %v648_v31, %v650_v37  ;;  %v850_v49 = vsel %vm845_vm2, %v847_v32, %v849_v40  ;;  %v657_v52 = vrot.slane %v3916_v45, 1  ;;  %v476_v53 = vrot.slane %v386_v46, 7  ;;  %v391_v36 = vld [vmem:[%s3865_s15 + $0x50] sm:$0xff]  ;;  %v392_v37 = vld [vmem:[%s3865_s15 + $0x58] sm:$0xff] }
  0x26   : > { %v857_v54 = vrot.slane %v3912_v43, 2  ;;  %v859_v55 = vrot.slane %v594_v44, 2  ;;  %v661_v56 = vsel %vm646_vm1, %v658_v50, %v660_v51  ;;  %v856_v58 = vrot.slane %v3916_v45, 2 }
  0x27   : > { %v659_v57 = vsel %vm646_vm1, %v657_v52, %v658_v50  ;;  %v3932_v59 = vsel %vm465_vm0, 0.0, %v475_v48  ;;  %v3935_v60 = vsel %vm465_vm0, %v475_v48, %v476_v53  ;;  %v595_v61 = vsel %vm465_vm0, %v476_v53, 0.0 }
  0x28   : > { %v662_v0 = vrot.slane %v3932_v59, 1  ;;  %v860_v1 = vsel %vm845_vm2, %v857_v54, %v859_v55  ;;  %v858_v2 = vsel %vm845_vm2, %v856_v58, %v857_v54  ;;  %v663_v3 = vrot.slane %v3935_v60, 1  ;;  %v393_v55 = vld [vmem:[%s3865_s15 + $0x60] sm:$0xff] }
  0x29   : > { %942 = vrot.lane.b32.xlu1 %v855_v38, %s3762_s27  ;;  %936 = vrot.lane.b32.xlu0 %v848_v39, %s3762_s27  ;;  %v665_v4 = vrot.slane %v595_v61, 1  ;;  %v478_v5 = vrot.slane %v387_v62, 7  ;;  %v479_v6 = vrot.slane %v388_v63, 7  ;;  %v862_v7 = vrot.slane %v3935_v60, 2 }
  0x2a   : > { %v864_v8 = vrot.slane %v595_v61, 2  ;;  %v664_v10 = vsel %vm646_vm1, %v662_v0, %v663_v3  ;;  %v861_v12 = vrot.slane %v3932_v59, 2  ;;  %v481_v20 = vrot.slane %v389_v14, 7 }
  0x2b   : > { %v666_v9 = vsel %vm646_vm1, %v663_v3, %v665_v4  ;;  %v3955_v16 = vsel %vm465_vm0, %v478_v5, %v479_v6  ;;  %v596_v17 = vsel %vm465_vm0, %v479_v6, 0.0  ;;  %v3959_v18 = vsel %vm465_vm0, 0.0, %v478_v5 }
  0x2c   : > { %v865_v19 = vsel %vm845_vm2, %v862_v7, %v864_v8  ;;  %v482_v22 = vrot.slane %v390_v15, 7  ;;  %v863_v23 = vsel %vm845_vm2, %v861_v12, %v862_v7  ;;  %v668_v24 = vrot.slane %v3955_v16, 1  ;;  %v395_v7 = vld [vmem:[%s3865_s15 + $0x70] sm:$0xff]  ;;  %v396_v8 = vld [vmem:[%s3865_s15 + $0x78] sm:$0xff] }
  0x2d   : > { %739 = vrot.lane.b32.xlu1 %v651_v47, %s3761_s25  ;;  %938 = vrot.lane.b32.xlu0 %v850_v49, %s3762_s27  ;;  %v670_v25 = vrot.slane %v596_v17, 1  ;;  %v667_v26 = vrot.slane %v3959_v18, 1  ;;  %v867_v28 = vrot.slane %v3955_v16, 2  ;;  %v869_v32 = vrot.slane %v596_v17, 2 }
  0x2e   : > { %v3971_v29 = vsel %vm465_vm0, %v481_v20, %v482_v22  ;;  %v866_v33 = vrot.slane %v3959_v18, 2  ;;  %v597_v34 = vsel %vm465_vm0, %v482_v22, 0.0  ;;  %v3978_v35 = vsel %vm465_vm0, 0.0, %v481_v20  ;;  %v1119_v20 = vld [vmem:[%s5063_s3 + $0x8] sm:$0xff] }
  0x2f   : > { %v671_v30 = vsel %vm646_vm1, %v668_v24, %v670_v25  ;;  %v669_v31 = vsel %vm646_vm1, %v667_v26, %v668_v24  ;;  %v673_v38 = vrot.slane %v3971_v29, 1  ;;  %v870_v39 = vsel %vm845_vm2, %v867_v28, %v869_v32 }
  0x30   : > { %v868_v40 = vsel %vm845_vm2, %v866_v33, %v867_v28  ;;  %v675_v41 = vrot.slane %v597_v34, 1  ;;  %v672_v42 = vrot.slane %v3978_v35, 1  ;;  %v484_v44 = vrot.slane %v391_v36, 7 }
  0x31   : > { %747 = vrot.lane.b32.xlu1 %v661_v56, %s3761_s25  ;;  %745 = vrot.lane.b32.xlu0 %v659_v57, %s3761_s25  ;;  %v485_v46 = vrot.slane %v392_v37, 7  ;;  %v872_v47 = vrot.slane %v3971_v29, 2  ;;  %v874_v48 = vrot.slane %v597_v34, 2  ;;  %v871_v51 = vrot.slane %v3978_v35, 2  ;;  %v394_v56 = vld [vmem:[%s3865_s15 + $0x68] sm:$0xff] }
  0x32   : > { %v676_v49 = vsel %vm646_vm1, %v673_v38, %v675_v41  ;;  %v674_v50 = vsel %vm646_vm1, %v672_v42, %v673_v38  ;;  %v3999_v54 = vsel %vm465_vm0, 0.0, %v484_v44  ;;  %v487_v0 = vrot.slane %v393_v55, 7  ;;  %v3227_v41 = vld [vmem:[%s5063_s3 + $0x30] sm:$0xff]  ;;  %v3228_v42 = vld [vmem:[%s5063_s3 + $0x38] sm:$0xff] }
  0x33   : > { %v3995_v52 = vsel %vm465_vm0, %v484_v44, %v485_v46  ;;  %v598_v53 = vsel %vm465_vm0, %v485_v46, 0.0  ;;  %v875_v57 = vsel %vm845_vm2, %v872_v47, %v874_v48  ;;  %v873_v58 = vsel %vm845_vm2, %v871_v51, %v872_v47 }
  0x34   : > { %v678_v61 = vrot.slane %v3995_v52, 1  ;;  %v680_v62 = vrot.slane %v598_v53, 1  ;;  %v677_v63 = vrot.slane %v3999_v54, 1  ;;  %v879_v3 = vrot.slane %v598_v53, 2 }
  0x35   : > { %946 = vrot.lane.b32.xlu1 %v860_v1, %s3762_s27  ;;  %944 = vrot.lane.b32.xlu0 %v858_v2, %s3762_s27  ;;  %v488_v1 = vrot.slane %v394_v56, 7  ;;  %v877_v2 = vrot.slane %v3995_v52, 2  ;;  %v876_v6 = vrot.slane %v3999_v54, 2  ;;  %v4022_v12 = vsel %vm465_vm0, 0.0, %v487_v0 }
  0x36   : > { %v681_v4 = vsel %vm646_vm1, %v678_v61, %v680_v62  ;;  %v679_v5 = vsel %vm646_vm1, %v677_v63, %v678_v61  ;;  %v490_v15 = vrot.slane %v395_v7, 7  ;;  %v491_v17 = vrot.slane %v396_v8, 7  ;;  %v399_v62 = vld [vmem:[%s3865_s15 + $0x90] sm:$0xff]  ;;  %v400_v63 = vld [vmem:[%s3865_s15 + $0x98] sm:$0xff] }
  0x37   : > { %v880_v14 = vsel %vm845_vm2, %v877_v2, %v879_v3  ;;  %v878_v22 = vsel %vm845_vm2, %v876_v6, %v877_v2  ;;  %v682_v25 = vrot.slane %v4022_v12, 1  ;;  %v881_v34 = vrot.slane %v4022_v12, 2 }
  0x38   : > { %v4050_v36 = vsel %vm465_vm0, %v490_v15, %v491_v17  ;;  %v600_v37 = vsel %vm465_vm0, %v491_v17, 0.0  ;;  %v4056_v38 = vsel %vm465_vm0, 0.0, %v490_v15  ;;  %v4075_v53 = vpack.c.bf16 %v3228_v42, %v3227_v41 }
  0x39   : > { %751 = vrot.lane.b32.xlu1 %v666_v9, %s3761_s25  ;;  %749 = vrot.lane.b32.xlu0 %v664_v10, %s3761_s25  ;;  %v4018_v9 = vsel %vm465_vm0, %v487_v0, %v488_v1  ;;  %v599_v10 = vsel %vm465_vm0, %v488_v1, 0.0  ;;  %v688_v44 = vrot.slane %v4050_v36, 1  ;;  %v690_v48 = vrot.slane %v600_v37, 1 }
  0x3a   : > { %v685_v24 = vrot.slane %v599_v10, 1  ;;  %v882_v28 = vrot.slane %v4018_v9, 2  ;;  %v887_v55 = vrot.slane %v4050_v36, 2  ;;  %v889_v56 = vrot.slane %v600_v37, 2 }
  0x3b   : > { %v886_v61 = vrot.slane %v4056_v38, 2 }
  0x3c   : > { %v883_v47 = vsel %vm845_vm2, %v881_v34, %v882_v28  ;;  %v890_v3 = vsel %vm845_vm2, %v887_v55, %v889_v56 }
  0x3d   : > { %950 = vrot.lane.b32.xlu1 %v865_v19, %s3762_s27  ;;  %948 = vrot.lane.b32.xlu0 %v863_v23, %s3762_s27  ;;  %v1118_v19 = vld [vmem:[%s5063_s3] sm:$0xff]  ;;  %v683_v23 = vrot.slane %v4018_v9, 1  ;;  %v888_v6 = vsel %vm845_vm2, %v886_v61, %v887_v55 }
  0x3e   : > { %v4036_v26 = vpack.c.bf16 %v1119_v20, %v1118_v19 }
  0x3f   : > { %v686_v32 = vsel %vm646_vm1, %v683_v23, %v685_v24  ;;  %v684_v33 = vsel %vm646_vm1, %v682_v25, %v683_v23  ;;  %v401_v25 = vld [vmem:[%s3865_s15 + $0xa0] sm:$0xff] }
  0x40   : > { %3546 = vmatprep.subr.bf16.mxu0 %v4036_v26  ;;  %3553 = vmatprep.subr.bf16.mxu1 %v4036_v26 }
  0x41   : > { %755 = vrot.lane.b32.xlu1 %v671_v30, %s3761_s25  ;;  %753 = vrot.lane.b32.xlu0 %v669_v31, %s3761_s25  ;;  %v884_v30 = vrot.slane %v599_v10, 2  ;;  %v4044_v31 = vld [vmem:[%s5063_s3 + $0x10] sm:$0xff] }
  0x42   : > { %3548 = vmatpush3.bf16.msra.mxu0 %v4036_v26 }
  0x43   : > { %3437 = vmatprep.subr.mxu0 %v4044_v31  ;;  %v885_v46 = vsel %vm845_vm2, %v882_v28, %v884_v30  ;;  %v402_v28 = vld [vmem:[%s3865_s15 + $0xa8] sm:$0xff] }
  0x45   : > { %954 = vrot.lane.b32.xlu1 %v870_v39, %s3762_s27  ;;  %952 = vrot.lane.b32.xlu0 %v868_v40, %s3762_s27  ;;  %v397_v39 = vld [vmem:[%s3865_s15 + $0x80] sm:$0xff]  ;;  %v398_v40 = vld [vmem:[%s3865_s15 + $0x88] sm:$0xff] }
  0x46   : > { %v494_v51 = vrot.slane %v398_v40, 7  ;;  %3438 = vmatpush3.msra.mxu0 %v4044_v31  ;;  %v500_v40 = vrot.slane %v402_v28, 7 }
  0x47   : > { %3550 = vmatprep.subr.bf16.mxu0 %v4075_v53 }
  0x48   : > { %v601_v1 = vsel %vm465_vm0, %v494_v51, 0.0 }
  0x49   : > { %759 = vrot.lane.b32.xlu1 %v676_v49, %s3761_s25  ;;  %757 = vrot.lane.b32.xlu0 %v674_v50, %s3761_s25  ;;  %v687_v49 = vrot.slane %v4056_v38, 1  ;;  %v493_v50 = vrot.slane %v397_v39, 7  ;;  %v695_v8 = vrot.slane %v601_v1, 1  ;;  %v894_v20 = vrot.slane %v601_v1, 2 }
  0x4a   : > { %v499_v39 = vrot.slane %v401_v25, 7 }
  0x4b   : > { %v4087_v0 = vsel %vm465_vm0, %v493_v50, %v494_v51  ;;  %v4091_v2 = vsel %vm465_vm0, 0.0, %v493_v50  ;;  %v603_v51 = vsel %vm465_vm0, %v500_v40, 0.0 }
  0x4c   : > { %v693_v7 = vrot.slane %v4087_v0, 1  ;;  %v692_v10 = vrot.slane %v4091_v2, 1  ;;  %v4129_v50 = vsel %vm465_vm0, %v499_v39, %v500_v40  ;;  %v4133_v55 = vsel %vm465_vm0, 0.0, %v499_v39 }
  0x4d   : > { %958 = vrot.lane.b32.xlu1 %v875_v57, %s3762_s27  ;;  %956 = vrot.lane.b32.xlu0 %v873_v58, %s3762_s27  ;;  %v691_v57 = vsel %vm646_vm1, %v688_v44, %v690_v48  ;;  %v689_v58 = vsel %vm646_vm1, %v687_v49, %v688_v44  ;;  %v403_v48 = vld [vmem:[%s3865_s15 + $0xb0] sm:$0xff]  ;;  %v404_v49 = vld [vmem:[%s3865_s15 + $0xb8] sm:$0xff]  ;;  %v702_v1 = vrot.slane %v4133_v55, 1 }
  0x4e   : > { %v696_v17 = vsel %vm646_vm1, %v693_v7, %v695_v8  ;;  %v694_v19 = vsel %vm646_vm1, %v692_v10, %v693_v7  ;;  %v901_v7 = vrot.slane %v4133_v55, 2 }
  0x51   : > { %763 = vrot.lane.b32.xlu1 %v681_v4, %s3761_s25  ;;  %761 = vrot.lane.b32.xlu0 %v679_v5, %s3761_s25  ;;  %v496_v4 = vrot.slane %v399_v62, 7  ;;  %v497_v5 = vrot.slane %v400_v63, 7  ;;  %v703_v62 = vrot.slane %v4129_v50, 1  ;;  %v705_v63 = vrot.slane %v603_v51, 1 }
  0x53   : > { %v4103_v15 = vsel %vm465_vm0, %v496_v4, %v497_v5  ;;  %v602_v23 = vsel %vm465_vm0, %v497_v5, 0.0  ;;  %v4110_v24 = vsel %vm465_vm0, 0.0, %v496_v4  ;;  %v904_v4 = vrot.slane %v603_v51, 2 }
  0x54   : > { %v698_v30 = vrot.slane %v4103_v15, 1  ;;  %v700_v34 = vrot.slane %v602_v23, 1  ;;  %v697_v37 = vrot.slane %v4110_v24, 1  ;;  %v897_v41 = vrot.slane %v4103_v15, 2 }
  0x55   : > { %962 = vrot.lane.b32.xlu1 %v880_v14, %s3762_s27  ;;  %960 = vrot.lane.b32.xlu0 %v878_v22, %s3762_s27  ;;  %v892_v14 = vrot.slane %v4087_v0, 2  ;;  %v891_v22 = vrot.slane %v4091_v2, 2  ;;  %v899_v42 = vrot.slane %v602_v23, 2  ;;  %v706_v5 = vsel %vm646_vm1, %v703_v62, %v705_v63 }
  0x56   : > { %v701_v44 = vsel %vm646_vm1, %v698_v30, %v700_v34 }
  0x57   : > { %v900_v56 = vsel %vm845_vm2, %v897_v41, %v899_v42  ;;  %v408_v42 = vld [vmem:[%s3865_s15 + $0xd8] sm:$0xff] }
  0x58   : > { %v509_v51 = vrot.slane %v408_v42, 7 }
  0x59   : > { %767 = vrot.lane.b32.xlu1 %v686_v32, %s3761_s25  ;;  %765 = vrot.lane.b32.xlu0 %v684_v33, %s3761_s25  ;;  %v895_v32 = vsel %vm845_vm2, %v892_v14, %v894_v20  ;;  %v893_v33 = vsel %vm845_vm2, %v891_v22, %v892_v14 }
  0x5d   : > { %966 = vrot.lane.b32.xlu1 %v885_v46, %s3762_s27  ;;  %964 = vrot.lane.b32.xlu0 %v883_v47, %s3762_s27  ;;  %v699_v46 = vsel %vm646_vm1, %v697_v37, %v698_v30  ;;  %v896_v47 = vrot.slane %v4110_v24, 2 }
  0x5f   : > { %v898_v61 = vsel %vm845_vm2, %v896_v47, %v897_v41  ;;  %v407_v41 = vld [vmem:[%s3865_s15 + $0xd0] sm:$0xff] }
  0x61   : > { %771 = vrot.lane.b32.xlu1 %v691_v57, %s3761_s25  ;;  %769 = vrot.lane.b32.xlu0 %v689_v58, %s3761_s25  ;;  %v502_v57 = vrot.slane %v403_v48, 7  ;;  %v503_v58 = vrot.slane %v404_v49, 7  ;;  %v508_v49 = vrot.slane %v407_v41, 7 }
  0x63   : > { %v4148_v8 = vsel %vm465_vm0, %v502_v57, %v503_v58  ;;  %v604_v10 = vsel %vm465_vm0, %v503_v58, 0.0  ;;  %v4152_v14 = vsel %vm465_vm0, 0.0, %v502_v57  ;;  %v4187_v63 = vsel %vm465_vm0, %v508_v49, %v509_v51 }
  0x64   : > { %v708_v20 = vrot.slane %v4148_v8, 1  ;;  %v710_v25 = vrot.slane %v604_v10, 1  ;;  %v707_v28 = vrot.slane %v4152_v14, 1  ;;  %v909_v34 = vrot.slane %v604_v10, 2  ;;  %v409_v10 = vld [vmem:[%s3865_s15 + $0xe0] sm:$0xff] }
  0x65   : > { %970 = vrot.lane.b32.xlu1 %v890_v3, %s3762_s27  ;;  %968 = vrot.lane.b32.xlu0 %v888_v6, %s3762_s27  ;;  %v902_v3 = vrot.slane %v4129_v50, 2  ;;  %v704_v6 = vsel %vm646_vm1, %v702_v1, %v703_v62  ;;  %v906_v40 = vrot.slane %v4152_v14, 2 }
  0x66   : > { %v711_v37 = vsel %vm646_vm1, %v708_v20, %v710_v25  ;;  %v709_v39 = vsel %vm646_vm1, %v707_v28, %v708_v20  ;;  %v511_v28 = vrot.slane %v409_v10, 7 }
  0x67   : > { %v905_v22 = vsel %vm845_vm2, %v902_v3, %v904_v4  ;;  %v903_v23 = vsel %vm845_vm2, %v901_v7, %v902_v3  ;;  %v4194_v7 = vsel %vm465_vm0, 0.0, %v508_v49 }
  0x68   : > { %v717_v25 = vrot.slane %v4194_v7, 1 }
  0x69   : > { %775 = vrot.lane.b32.xlu1 %v696_v17, %s3761_s25  ;;  %773 = vrot.lane.b32.xlu0 %v694_v19, %s3761_s25  ;;  %v405_v17 = vld [vmem:[%s3865_s15 + $0xc0] sm:$0xff]  ;;  %v406_v19 = vld [vmem:[%s3865_s15 + $0xc8] sm:$0xff] }
  0x6a   : > { %v505_v30 = vrot.slane %v405_v17, 7  ;;  %v410_v17 = vld [vmem:[%s3865_s15 + $0xe8] sm:$0xff] }
  0x6c   : > { %v4175_v47 = vsel %vm465_vm0, 0.0, %v505_v30 }
  0x6d   : > { %974 = vrot.lane.b32.xlu1 %v895_v32, %s3762_s27  ;;  %972 = vrot.lane.b32.xlu0 %v893_v33, %s3762_s27  ;;  %v506_v32 = vrot.slane %v406_v19, 7  ;;  %v907_v33 = vrot.slane %v4148_v8, 2  ;;  %v718_v19 = vrot.slane %v4187_v63, 1 }
  0x6f   : > { %v910_v48 = vsel %vm845_vm2, %v907_v33, %v909_v34 }
  0x71   : > { %779 = vrot.lane.b32.xlu1 %v701_v44, %s3761_s25  ;;  %777 = vrot.lane.b32.xlu0 %v699_v46, %s3761_s25  ;;  %v4171_v44 = vsel %vm465_vm0, %v505_v30, %v506_v32  ;;  %v605_v46 = vsel %vm465_vm0, %v506_v32, 0.0  ;;  %v512_v30 = vrot.slane %v410_v17, 7  ;;  %v917_v32 = vrot.slane %v4187_v63, 2 }
  0x72   : > { %v713_v57 = vrot.slane %v4171_v44, 1  ;;  %v715_v58 = vrot.slane %v605_v46, 1  ;;  %v912_v62 = vrot.slane %v4171_v44, 2  ;;  %v914_v4 = vrot.slane %v605_v46, 2 }
  0x73   : > { %v4212_v41 = vsel %vm465_vm0, %v511_v28, %v512_v30  ;;  %v607_v42 = vsel %vm465_vm0, %v512_v30, 0.0  ;;  %v4216_v46 = vsel %vm465_vm0, 0.0, %v511_v28 }
  0x74   : > { %v716_v1 = vsel %vm646_vm1, %v713_v57, %v715_v58  ;;  %v915_v20 = vsel %vm845_vm2, %v912_v62, %v914_v4  ;;  %v725_v58 = vrot.slane %v607_v42, 1  ;;  %v922_v4 = vrot.slane %v4212_v41, 2 }
  0x75   : > { %978 = vrot.lane.b32.xlu1 %v900_v56, %s3762_s27  ;;  %976 = vrot.lane.b32.xlu0 %v898_v61, %s3762_s27  ;;  %v908_v56 = vsel %vm845_vm2, %v906_v40, %v907_v33  ;;  %v712_v61 = vrot.slane %v4175_v47, 1  ;;  %v411_v40 = vld [vmem:[%s3865_s15 + $0xf0] sm:$0xff]  ;;  %v921_v17 = vrot.slane %v4216_v46, 2 }
  0x77   : > { %v714_v3 = vsel %vm646_vm1, %v712_v61, %v713_v57  ;;  %v723_v57 = vrot.slane %v4212_v41, 1  ;;  %v722_v61 = vrot.slane %v4216_v46, 1 }
  0x79   : > { %783 = vrot.lane.b32.xlu1 %v706_v5, %s3761_s25  ;;  %781 = vrot.lane.b32.xlu0 %v704_v6, %s3761_s25  ;;  %v911_v5 = vrot.slane %v4175_v47, 2  ;;  %v606_v6 = vsel %vm465_vm0, %v509_v51, 0.0  ;;  %v514_v51 = vrot.slane %v411_v40, 7  ;;  %v724_v10 = vsel %vm646_vm1, %v722_v61, %v723_v57 }
  0x7a   : > { %v919_v33 = vrot.slane %v606_v6, 2  ;;  %v923_v40 = vsel %vm845_vm2, %v921_v17, %v922_v4 }
  0x7c   : > { %v920_v49 = vsel %vm845_vm2, %v917_v32, %v919_v33 }
  0x7d   : > { %982 = vrot.lane.b32.xlu1 %v905_v22, %s3762_s27  ;;  %980 = vrot.lane.b32.xlu0 %v903_v23, %s3762_s27  ;;  %v913_v22 = vsel %vm845_vm2, %v911_v5, %v912_v62  ;;  %v720_v23 = vrot.slane %v606_v6, 1  ;;  %v924_v5 = vrot.slane %v607_v42, 2  ;;  %v726_v6 = vsel %vm646_vm1, %v723_v57, %v725_v58 }
  0x7f   : > { %v721_v34 = vsel %vm646_vm1, %v718_v19, %v720_v23 }
  0x81   : > { %787 = vrot.lane.b32.xlu1 %v711_v37, %s3761_s25  ;;  %785 = vrot.lane.b32.xlu0 %v709_v39, %s3761_s25  ;;  %v719_v37 = vsel %vm646_vm1, %v717_v25, %v718_v19  ;;  %v916_v39 = vrot.slane %v4194_v7, 2  ;;  %v4236_v19 = vsel %vm465_vm0, 0.0, %v514_v51 }
  0x85   : > { %986 = vrot.lane.b32.xlu1 %v910_v48, %s3762_s27  ;;  %984 = vrot.lane.b32.xlu0 %v908_v56, %s3762_s27  ;;  %v412_v48 = vld [vmem:[%s3865_s15 + $0xf8] sm:$0xff]  ;;  %v918_v56 = vsel %vm845_vm2, %v916_v39, %v917_v32 }
  0x89   : > { %791 = vrot.lane.b32.xlu1 %v716_v1, %s3761_s25  ;;  %789 = vrot.lane.b32.xlu0 %v714_v3, %s3761_s25  ;;  %v515_v3 = vrot.slane %v412_v48, 7 }
  0x8b   : > { %v4241_v30 = vsel %vm465_vm0, %v514_v51, %v515_v3  ;;  %v608_v32 = vsel %vm465_vm0, %v515_v3, 0.0 }
  0x8c   : > { %v728_v42 = vrot.slane %v4241_v30, 1  ;;  %v730_v48 = vrot.slane %v608_v32, 1 }
  0x8d   : > { %990 = vrot.lane.b32.xlu1 %v915_v20, %s3762_s27  ;;  %988 = vrot.lane.b32.xlu0 %v913_v22, %s3762_s27  ;;  %v424_v20 = vld [vmem:[%s375_s12] sm:$0xff]  ;;  %v425_v22 = vld [vmem:[%s375_s12 + $0x8] sm:$0xff]  ;;  %s5003_s12 = scalar_lea.hbm %s5065_s5, %s3272_s29 }
  0x8e   : > { %v428_v39 = vmul.f32 0.0, %v425_v22 }
  0x91   : > { %795 = vrot.lane.b32.xlu1 %v721_v34, %s3761_s25  ;;  %793 = vrot.lane.b32.xlu0 %v719_v37, %s3761_s25  ;;  %v727_v34 = vrot.slane %v4236_v19, 1  ;;  %v427_v37 = vmul.f32 0.0, %v424_v20 }
  0x93   : > { %v744_v62 = vpop.permute.xlu1 %743  ;;  %v742_v1 = vpop.permute.xlu0 %741  ;;  %v517_v3 = vrot.slane %v427_v37, 7 }
  0x94   : > { %v1047_v23 = vsel %vm1044_vm3, %v3878_v13, %v742_v1  ;;  %v925_v13 = vsel %vm845_vm2, %v922_v4, %v924_v5  ;;  %v926_v1 = vrot.slane %v4236_v19, 2  ;;  %v518_v4 = vrot.slane %v428_v39, 7 }
  0x95   : > { %994 = vrot.lane.b32.xlu1 %v920_v49, %s3762_s27  ;;  %992 = vrot.lane.b32.xlu0 %v918_v56, %s3762_s27  ;;  %v1048_v49 = vsel %vm1044_vm3, %v3874_v11, %v744_v62  ;;  %v731_v11 = vsel %vm646_vm1, %v728_v42, %v730_v48  ;;  %v927_v62 = vrot.slane %v4241_v30, 2  ;;  %v929_v5 = vrot.slane %v608_v32, 2 }
  0x96   : > { %v4274_v22 = vsel %vm465_vm0, %v517_v3, %v518_v4 }
  0x97   : > { %v941_v25 = vpop.permute.xlu1 %940  ;;  %v738_v28 = vpop.permute.xlu0 %737  ;;  %v733_v39 = vrot.slane %v4274_v22, 1 }
  0x98   : > { %v1084_v33 = vsel %vm1081_vm4, %v1047_v23, %v941_v25  ;;  %v1045_v51 = vsel %vm1044_vm3, %v3885_v21, %v738_v28  ;;  %v729_v21 = vsel %vm646_vm1, %v727_v34, %v728_v42  ;;  %v4277_v23 = vsel %vm465_vm0, 0.0, %v517_v3 }
  0x99   : > { %799 = vrot.lane.b32.xlu1 %v726_v6, %s3761_s25  ;;  %797 = vrot.lane.b32.xlu0 %v724_v10, %s3761_s25  ;;  %v609_v25 = vsel %vm465_vm0, %v518_v4, 0.0  ;;  %v928_v28 = vsel %vm845_vm2, %v926_v1, %v927_v62  ;;  %v732_v37 = vrot.slane %v4277_v23, 1 }
  0x9a   : > { %3385 = vmatprep.mubr.msk.f32.mxu1 %vm1125_vm5, %v1084_v33 }
  0x9b   : > { %v943_v56 = vpop.permute.xlu1 %942  ;;  %v937_v57 = vpop.permute.xlu0 %936 }
  0x9c   : > { %v1085_v58 = vsel %vm1081_vm4, %v1048_v49, %v943_v56  ;;  %v1082_v61 = vsel %vm1081_vm4, %v1045_v51, %v937_v57  ;;  %v932_v49 = vrot.slane %v4274_v22, 2  ;;  %v934_v51 = vrot.slane %v609_v25, 2 }
  0x9d   : > { %998 = vrot.lane.b32.xlu1 %v925_v13, %s3762_s27  ;;  %996 = vrot.lane.b32.xlu0 %v923_v40, %s3762_s27  ;;  %v735_v13 = vrot.slane %v609_v25, 1  ;;  %v931_v40 = vrot.slane %v4277_v23, 2  ;;  %v734_v57 = vsel %vm646_vm1, %v732_v37, %v733_v39 }
  0x9e   : > { %3386 = vmatmul.mubr.msk.f32.vlgmr.msra.gmra.mrb[0].mxu1 %vm1125_vm5, %v1085_v58  ;;  %3439 = vmatprep.mubr.msk.f32.mxu0 %vm1125_vm5, %v1082_v61  ;;  %v935_v1 = vsel %vm845_vm2, %v932_v49, %v934_v51 }
  0x9f   : > { %v740_v6 = vpop.permute.xlu1 %739  ;;  %v939_v10 = vpop.permute.xlu0 %938  ;;  %3555 = vmatpush3.bf16.msra.mxu1 %v4036_v26  ;;  %v930_v26 = vsel %vm845_vm2, %v927_v62, %v929_v5  ;;  %v933_v61 = vsel %vm845_vm2, %v931_v40, %v932_v49 }
  0xa0   : > { %v1046_v17 = vsel %vm1044_vm3, %v3895_v27, %v740_v6  ;;  %3554 = vmatprep.subr.mxu1 %v4044_v31  ;;  %v3229_v27 = vld [vmem:[%s5063_s3 + $0x40] sm:$0xff] }
  0xa1   : > { %v1083_v20 = vsel %vm1081_vm4, %v1046_v17, %v939_v10  ;;  %803 = vrot.lane.b32.xlu1 %v731_v11, %s3761_s25  ;;  %801 = vrot.lane.b32.xlu0 %v729_v21, %s3761_s25 }
  0xa2   : > { %3440 = vmatmul.mubr.msk.f32.vlgmr.msra.gmra.mrb[0].mxu0 %vm1125_vm5, %v1083_v20 }
  0xa3   : > { %v748_v32 = vpop.permute.xlu1 %747  ;;  %3442 = vmatprep.mubr.msk.f32.mxu0 %vm1125_vm5, %v1084_v33  ;;  %v746_v34 = vpop.permute.xlu0 %745  ;;  %3552 = vmatpush3.bf16.msra.mxu0 %v4075_v53 }
  0xa4   : > { %3491 = vmatprep.subr.mxu0 %v3229_v27  ;;  %3556 = vmatpush3.msra.mxu1 %v4044_v31  ;;  %v1050_v33 = vsel %vm1044_vm3, %v3912_v43, %v748_v32  ;;  %v1049_v53 = vsel %vm1044_vm3, %v3916_v45, %v746_v34 }
  0xa5   : > { %1002 = vrot.lane.b32.xlu1 %v930_v26, %s3762_s27  ;;  %1000 = vrot.lane.b32.xlu0 %v928_v28, %s3762_s27 }
  0xa6   : > { %3443 = vmatmul.mubr.msk.f32.gmra.mrb[2].mxu0 %vm1125_vm5, %v1085_v58  ;;  %v736_v58 = vsel %vm646_vm1, %v733_v39, %v735_v13 }
  0xa7   : > { %v947_v42 = vpop.permute.xlu1 %946  ;;  %v945_v48 = vpop.permute.xlu0 %944  ;;  %3492 = vmatpush3.msra.mxu0 %v3229_v27 }
  0xa8   : > { %v4301_v31 = vsel %vm1081_vm4, %v1050_v33, %v947_v42  ;;  %v4304_v56 = vsel %vm1081_vm4, %v1049_v53, %v945_v48 }
  0xa9   : > { %3388 = vmatprep.mubr.msk.f32.mxu1 %vm1125_vm5, %v4304_v56  ;;  %3445 = vmatprep.mubr.msk.f32.mxu0 %vm1125_vm5, %v4304_v56 }
  0xaa   : > { %3389 = vmatmul.mubr.msk.f32.gmra.mrb[2].mxu1 %vm1125_vm5, %v4301_v31  ;;  %3446 = vmatmul.mubr.msk.f32.gmra.mrb[4].mxu0 %vm1125_vm5, %v4301_v31 }
  0xab   : > { %v752_v43 = vpop.permute.xlu1 %751  ;;  %v750_v45 = vpop.permute.xlu0 %749  ;;  %805 = vrot.lane.b32.xlu0 %v734_v57, %s3761_s25  ;;  %807 = vrot.lane.b32.xlu1 %v736_v58, %s3761_s25 }
  0xac   : > { %v1052_v3 = vsel %vm1044_vm3, %v3935_v60, %v752_v43  ;;  %v1051_v4 = vsel %vm1044_vm3, %v3932_v59, %v750_v45 }
  0xaf   : > { %v951_v11 = vpop.permute.xlu1 %950  ;;  %v949_v21 = vpop.permute.xlu0 %948  ;;  %1004 = vrot.lane.b32.xlu0 %v933_v61, %s3762_s27  ;;  %1006 = vrot.lane.b32.xlu1 %v935_v1, %s3762_s27  ;;  %s3685_s27 = sshll.u32 %s3764_s10, 4  ;;  %s3686_s27 = int_to_ptr.vmem [resolvable:$false] %s3685_s27 }
  0xb0   : > { %v4327_v62 = vsel %vm1081_vm4, %v1052_v3, %v951_v11  ;;  %v1088_v5 = vsel %vm1081_vm4, %v1051_v4, %v949_v21  ;;  %s3687_s11 = scalar_lea.vmem %s3686_s27, 2048  ;;  %p3688_p1 = scmp.lt.s32.totalorder %s5006_s7, %s3686_s27 }
  0xb1   : > { %3391 = vmatprep.mubr.msk.f32.mxu1 %vm1125_vm5, %v1088_v5  ;;  %3448 = vmatprep.mubr.msk.f32.mxu0 %vm1125_vm5, %v1088_v5  ;;  %p3689_p2 = scmp.lt.s32.totalorder %s3687_s11, %s3681_s9 }
  0xb2   : > { %3392 = vmatmul.mubr.msk.f32.gmra.mrb[4].mxu1 %vm1125_vm5, %v4327_v62  ;;  %3449 = vmatmul.mubr.msk.f32.gmra.mrb[6].mxu0 %vm1125_vm5, %v4327_v62 }
  0xb3   : > { %v756_v59 = vpop.permute.xlu1 %755  ;;  %v754_v60 = vpop.permute.xlu0 %753  ;;  %p3690_p3 = por %p3689_p2, %p3688_p1 }
  0xb4   : > { %v1054_v6 = vsel %vm1044_vm3, %v3955_v16, %v756_v59  ;;  %v1053_v10 = vsel %vm1044_vm3, %v3959_v18, %v754_v60 }
  0xb5   : > { %p3691_p5 = pnand %p3690_p3, %p3684_p0 }
  0xb7   : > { %v955_v17 = vpop.permute.xlu1 %954  ;;  %v953_v20 = vpop.permute.xlu0 %952 }
  0xb8   : > { %v1091_v25 = vsel %vm1081_vm4, %v1054_v6, %v955_v17  ;;  %v1090_v27 = vsel %vm1081_vm4, %v1053_v10, %v953_v20 }
  0xb9   : > { %3394 = vmatprep.mubr.msk.f32.mxu1 %vm1125_vm5, %v1090_v27  ;;  %3451 = vmatprep.mubr.msk.f32.mxu0 %vm1125_vm5, %v1090_v27 }
  0xba   : > { %3395 = vmatmul.mubr.msk.f32.gmra.mrb[6].mxu1 %vm1125_vm5, %v1091_v25  ;;  %3452 = vmatmul.mubr.msk.f32.gmra.mrb[8].mxu0 %vm1125_vm5, %v1091_v25 }
  0xbb   : > { %v760_v26 = vpop.permute.xlu1 %759  ;;  %v758_v28 = vpop.permute.xlu0 %757 }
  0xbc   : > { %v1056_v16 = vsel %vm1044_vm3, %v3971_v29, %v760_v26  ;;  %v1055_v18 = vsel %vm1044_vm3, %v3978_v35, %v758_v28 }
  0xbf   : > { %v959_v32 = vpop.permute.xlu1 %958  ;;  %v957_v34 = vpop.permute.xlu0 %956 }
  0xc0   : > { %v1093_v37 = vsel %vm1081_vm4, %v1056_v16, %v959_v32  ;;  %v1092_v39 = vsel %vm1081_vm4, %v1055_v18, %v957_v34 }
  0xc1   : > { %3397 = vmatprep.mubr.msk.f32.mxu1 %vm1125_vm5, %v1092_v39  ;;  %3454 = vmatprep.mubr.msk.f32.mxu0 %vm1125_vm5, %v1092_v39 }
  0xc2   : > { %3398 = vmatmul.mubr.msk.f32.gmra.mrb[8].mxu1 %vm1125_vm5, %v1093_v37  ;;  %3455 = vmatmul.mubr.msk.f32.gmra.mrb[10].mxu0 %vm1125_vm5, %v1093_v37 }
  0xc3   : > { %v764_v13 = vpop.permute.xlu1 %763  ;;  %v762_v40 = vpop.permute.xlu0 %761 }
  0xc4   : > { %v1058_v29 = vsel %vm1044_vm3, %v3995_v52, %v764_v13  ;;  %v1057_v35 = vsel %vm1044_vm3, %v3999_v54, %v762_v40 }
  0xc7   : > { %v963_v33 = vpop.permute.xlu1 %962  ;;  %v961_v53 = vpop.permute.xlu0 %960 }
  0xc8   : > { %v1095_v42 = vsel %vm1081_vm4, %v1058_v29, %v963_v33  ;;  %v1094_v48 = vsel %vm1081_vm4, %v1057_v35, %v961_v53 }
  0xc9   : > { %3400 = vmatprep.mubr.msk.f32.mxu1 %vm1125_vm5, %v1094_v48  ;;  %3457 = vmatprep.mubr.msk.f32.mxu0 %vm1125_vm5, %v1094_v48 }
  0xca   : > { %3401 = vmatmul.mubr.msk.f32.gmra.mrb[10].mxu1 %vm1125_vm5, %v1095_v42  ;;  %3458 = vmatmul.mubr.msk.f32.gmra.mrb[12].mxu0 %vm1125_vm5, %v1095_v42 }
  0xcb   : > { %v768_v49 = vpop.permute.xlu1 %767  ;;  %v766_v51 = vpop.permute.xlu0 %765 }
  0xcc   : > { %v1060_v52 = vsel %vm1044_vm3, %v4018_v9, %v768_v49  ;;  %v1059_v54 = vsel %vm1044_vm3, %v4022_v12, %v766_v51 }
  0xcf   : > { %v967_v57 = vpop.permute.xlu1 %966  ;;  %v965_v58 = vpop.permute.xlu0 %964 }
  0xd0   : > { %v1097_v43 = vsel %vm1081_vm4, %v1060_v52, %v967_v57  ;;  %v1096_v45 = vsel %vm1081_vm4, %v1059_v54, %v965_v58 }
  0xd1   : > { %3403 = vmatprep.mubr.msk.f32.mxu1 %vm1125_vm5, %v1096_v45  ;;  %3460 = vmatprep.mubr.msk.f32.mxu0 %vm1125_vm5, %v1096_v45 }
  0xd2   : > { %3404 = vmatmul.mubr.msk.f32.gmra.mrb[12].mxu1 %vm1125_vm5, %v1097_v43  ;;  %3461 = vmatmul.mubr.msk.f32.gmra.mrb[14].mxu0 %vm1125_vm5, %v1097_v43 }
  0xd3   : > { %v772_v61 = vpop.permute.xlu1 %771  ;;  %3493 = vmatprep.mubr.msk.f32.mxu0 %vm1125_vm5, %v4304_v56  ;;  %v770_v9 = vpop.permute.xlu0 %769 }
  0xd4   : > { %v1062_v12 = vsel %vm1044_vm3, %v4050_v36, %v772_v61  ;;  %v1061_v1 = vsel %vm1044_vm3, %v4056_v38, %v770_v9 }
  0xd6   : > { %3494 = vmatmul.mubr.msk.f32.vlgmr.msra.gmra.mrb[0].mxu0 %vm1125_vm5, %v4301_v31 }
  0xd7   : > { %v971_v3 = vpop.permute.xlu1 %970  ;;  %3496 = vmatprep.mubr.msk.f32.mxu0 %vm1125_vm5, %v1088_v5  ;;  %v969_v4 = vpop.permute.xlu0 %968 }
  0xd8   : > { %v4386_v11 = vsel %vm1081_vm4, %v1062_v12, %v971_v3  ;;  %v4389_v21 = vsel %vm1081_vm4, %v1061_v1, %v969_v4 }
  0xd9   : > { %3406 = vmatprep.mubr.msk.f32.mxu1 %vm1125_vm5, %v4389_v21 }
  0xda   : > { %3407 = vmatmul.mubr.msk.f32.gmra.mrb[14].mxu1 %vm1125_vm5, %v4386_v11  ;;  %3497 = vmatmul.mubr.msk.f32.gmra.mrb[2].mxu0 %vm1125_vm5, %v4327_v62 }
  0xdb   : > { %v776_v36 = vpop.permute.xlu1 %775  ;;  %3499 = vmatprep.mubr.msk.f32.mxu0 %vm1125_vm5, %v1090_v27  ;;  %v774_v38 = vpop.permute.xlu0 %773 }
  0xdc   : > { %v1064_v31 = vsel %vm1044_vm3, %v4087_v0, %v776_v36  ;;  %v1063_v56 = vsel %vm1044_vm3, %v4091_v2, %v774_v38 }
  0xde   : > { %3500 = vmatmul.mubr.msk.f32.gmra.mrb[4].mxu0 %vm1125_vm5, %v1091_v25 }
  0xdf   : > { %v975_v5 = vpop.permute.xlu1 %974  ;;  %3502 = vmatprep.mubr.msk.f32.mxu0 %vm1125_vm5, %v1092_v39  ;;  %v973_v59 = vpop.permute.xlu0 %972 }
  0xe0   : > { %v4405_v60 = vsel %vm1081_vm4, %v1064_v31, %v975_v5  ;;  %v4408_v62 = vsel %vm1081_vm4, %v1063_v56, %v973_v59 }
  0xe1   : > { %3409 = vmatprep.mubr.msk.f32.mxu1 %vm1125_vm5, %v4408_v62 }
  0xe2   : > { %3410 = vmatmul.mubr.msk.f32.gmra.mrb[16].mxu1 %vm1125_vm5, %v4405_v60  ;;  %3503 = vmatmul.mubr.msk.f32.gmra.mrb[6].mxu0 %vm1125_vm5, %v1093_v37 }
  0xe3   : > { %v780_v0 = vpop.permute.xlu1 %779  ;;  %3505 = vmatprep.mubr.msk.f32.mxu0 %vm1125_vm5, %v1094_v48  ;;  %v778_v2 = vpop.permute.xlu0 %777 }
  0xe4   : > { %v1066_v6 = vsel %vm1044_vm3, %v4103_v15, %v780_v0  ;;  %v1065_v10 = vsel %vm1044_vm3, %v4110_v24, %v778_v2 }
  0xe6   : > { %3506 = vmatmul.mubr.msk.f32.gmra.mrb[8].mxu0 %vm1125_vm5, %v1095_v42 }
  0xe7   : > { %v979_v17 = vpop.permute.xlu1 %978  ;;  %3508 = vmatprep.mubr.msk.f32.mxu0 %vm1125_vm5, %v1096_v45  ;;  %v977_v20 = vpop.permute.xlu0 %976 }
  0xe8   : > { %v4423_v25 = vsel %vm1081_vm4, %v1066_v6, %v979_v17  ;;  %v4426_v27 = vsel %vm1081_vm4, %v1065_v10, %v977_v20 }
  0xe9   : > { %3412 = vmatprep.mubr.msk.f32.mxu1 %vm1125_vm5, %v4426_v27 }
  0xea   : > { %3413 = vmatmul.mubr.msk.f32.gmra.mrb[18].mxu1 %vm1125_vm5, %v4423_v25  ;;  %3509 = vmatmul.mubr.msk.f32.gmra.mrb[10].mxu0 %vm1125_vm5, %v1097_v43 }
  0xeb   : > { %v784_v15 = vpop.permute.xlu1 %783  ;;  %3511 = vmatprep.mubr.msk.f32.mxu0 %vm1125_vm5, %v4389_v21  ;;  %v782_v24 = vpop.permute.xlu0 %781 }
  0xec   : > { %v1068_v26 = vsel %vm1044_vm3, %v4129_v50, %v784_v15  ;;  %v1067_v28 = vsel %vm1044_vm3, %v4133_v55, %v782_v24 }
  0xee   : > { %3512 = vmatmul.mubr.msk.f32.gmra.mrb[12].mxu0 %vm1125_vm5, %v4386_v11 }
  0xef   : > { %v983_v16 = vpop.permute.xlu1 %982  ;;  %3514 = vmatprep.mubr.msk.f32.mxu0 %vm1125_vm5, %v4408_v62  ;;  %v981_v18 = vpop.permute.xlu0 %980 }
  0xf0   : > { %v4444_v32 = vsel %vm1081_vm4, %v1068_v26, %v983_v16  ;;  %v4447_v34 = vsel %vm1081_vm4, %v1067_v28, %v981_v18 }
  0xf1   : > { %3415 = vmatprep.mubr.msk.f32.mxu1 %vm1125_vm5, %v4447_v34 }
  0xf2   : > { %3416 = vmatmul.mubr.msk.f32.gmra.mrb[20].mxu1 %vm1125_vm5, %v4444_v32  ;;  %3515 = vmatmul.mubr.msk.f32.gmra.mrb[14].mxu0 %vm1125_vm5, %v4405_v60 }
  0xf3   : > { %v788_v50 = vpop.permute.xlu1 %787  ;;  %3517 = vmatprep.mubr.msk.f32.mxu0 %vm1125_vm5, %v4426_v27  ;;  %v786_v55 = vpop.permute.xlu0 %785 }
  0xf4   : > { %v1070_v37 = vsel %vm1044_vm3, %v4148_v8, %v788_v50  ;;  %v1069_v39 = vsel %vm1044_vm3, %v4152_v14, %v786_v55 }
  0xf6   : > { %3518 = vmatmul.mubr.msk.f32.gmra.mrb[16].mxu0 %vm1125_vm5, %v4423_v25 }
  0xf7   : > { %v987_v13 = vpop.permute.xlu1 %986  ;;  %3520 = vmatprep.mubr.msk.f32.mxu0 %vm1125_vm5, %v4447_v34  ;;  %v985_v40 = vpop.permute.xlu0 %984 }
  0xf8   : > { %v4466_v29 = vsel %vm1081_vm4, %v1070_v37, %v987_v13  ;;  %v4469_v35 = vsel %vm1081_vm4, %v1069_v39, %v985_v40  ;;  %v3763_v39 = vmov 1983009808   ;;  %v2084_v40 = vlaneseq }
  0xf9   : > { %3418 = vmatprep.mubr.msk.f32.mxu1 %vm1125_vm5, %v4469_v35  ;;  %v2082_v13 = vunpack.c.l.s4 %v3763_v39 }
  0xfa   : > { %3419 = vmatmul.mubr.msk.f32.gmra.mrb[22].mxu1 %vm1125_vm5, %v4466_v29  ;;  %3521 = vmatmul.mubr.msk.f32.gmra.mrb[18].mxu0 %vm1125_vm5, %v4444_v32 }
  0xfb   : > { %v792_v8 = vpop.permute.xlu1 %791  ;;  %3523 = vmatprep.mubr.msk.f32.mxu0 %vm1125_vm5, %v4469_v35  ;;  %v790_v14 = vpop.permute.xlu0 %789 }
  0xfc   : > { %v1072_v33 = vsel %vm1044_vm3, %v4171_v44, %v792_v8  ;;  %v1071_v53 = vsel %vm1044_vm3, %v4175_v47, %v790_v14 }
  0xfe   : > { %3524 = vmatmul.mubr.msk.f32.gmra.mrb[20].mxu0 %vm1125_vm5, %v4466_v29 }
  0xff   : > { %v991_v42 = vpop.permute.xlu1 %990  ;;  %v989_v48 = vpop.permute.xlu0 %988 }
 0x100   : > { %v4486_v49 = vsel %vm1081_vm4, %v1072_v33, %v991_v42  ;;  %v1108_v51 = vsel %vm1081_vm4, %v1071_v53, %v989_v48  ;;  %v2083_v48 = vunpack.c.0.s8 %v2082_v13 }
 0x101   : > { %3421 = vmatprep.mubr.msk.f32.mxu1 %vm1125_vm5, %v1108_v51  ;;  %3526 = vmatprep.mubr.msk.f32.mxu0 %vm1125_vm5, %v1108_v51 }
 0x102   : > { %3422 = vmatmul.mubr.msk.f32.gmra.mrb[24].mxu1 %vm1125_vm5, %v4486_v49  ;;  %3527 = vmatmul.mubr.msk.f32.gmra.mrb[22].mxu0 %vm1125_vm5, %v4486_v49 }
 0x103   : > { %v796_v44 = vpop.permute.xlu1 %795  ;;  %v794_v52 = vpop.permute.xlu0 %793 }
 0x104   : > { %v1074_v47 = vsel %vm1044_vm3, %v4187_v63, %v796_v44  ;;  %v1073_v54 = vsel %vm1044_vm3, %v4194_v7, %v794_v52 }
 0x107   : > { %v995_v57 = vpop.permute.xlu1 %994  ;;  %v993_v58 = vpop.permute.xlu0 %992 }
 0x108   : > { %v1111_v43 = vsel %vm1081_vm4, %v1074_v47, %v995_v57  ;;  %v1110_v45 = vsel %vm1081_vm4, %v1073_v54, %v993_v58 }
 0x109   : > { %3424 = vmatprep.mubr.msk.f32.mxu1 %vm1125_vm5, %v1110_v45  ;;  %3529 = vmatprep.mubr.msk.f32.mxu0 %vm1125_vm5, %v1110_v45 }
 0x10a   : > { %3425 = vmatmul.mubr.msk.f32.gmra.mrb[26].mxu1 %vm1125_vm5, %v1111_v43  ;;  %3530 = vmatmul.mubr.msk.f32.gmra.mrb[24].mxu0 %vm1125_vm5, %v1111_v43 }
 0x10b   : > { %v800_v61 = vpop.permute.xlu1 %799  ;;  %v798_v9 = vpop.permute.xlu0 %797 }
 0x10c   : > { %v1076_v63 = vsel %vm1044_vm3, %v4212_v41, %v800_v61  ;;  %v1075_v7 = vsel %vm1044_vm3, %v4216_v46, %v798_v9 }
 0x10f   : > { %v999_v12 = vpop.permute.xlu1 %998  ;;  %v997_v1 = vpop.permute.xlu0 %996 }
 0x110   : > { %v1113_v3 = vsel %vm1081_vm4, %v1076_v63, %v999_v12  ;;  %v1112_v4 = vsel %vm1081_vm4, %v1075_v7, %v997_v1 }
 0x111   : > { %3427 = vmatprep.mubr.msk.f32.mxu1 %vm1125_vm5, %v1112_v4  ;;  %3532 = vmatprep.mubr.msk.f32.mxu0 %vm1125_vm5, %v1112_v4 }
 0x112   : > { %3428 = vmatmul.mubr.msk.f32.gmra.mrb[28].mxu1 %vm1125_vm5, %v1113_v3  ;;  %3533 = vmatmul.mubr.msk.f32.gmra.mrb[26].mxu0 %vm1125_vm5, %v1113_v3 }
 0x113   : > { %v804_v36 = vpop.permute.xlu1 %803  ;;  %v802_v38 = vpop.permute.xlu0 %801 }
 0x114   : > { %v1078_v41 = vsel %vm1044_vm3, %v4241_v30, %v804_v36  ;;  %v1077_v46 = vsel %vm1044_vm3, %v4236_v19, %v802_v38 }
 0x117   : > { %v1003_v31 = vpop.permute.xlu1 %1002  ;;  %v1001_v56 = vpop.permute.xlu0 %1000 }
 0x118   : > { %v1115_v5 = vsel %vm1081_vm4, %v1078_v41, %v1003_v31  ;;  %v1114_v59 = vsel %vm1081_vm4, %v1077_v46, %v1001_v56 }
 0x119   : > { %3430 = vmatprep.mubr.msk.f32.mxu1 %vm1125_vm5, %v1114_v59  ;;  %3535 = vmatprep.mubr.msk.f32.mxu0 %vm1125_vm5, %v1114_v59 }
 0x11a   : > { %3431 = vmatmul.mubr.msk.f32.gmra.mrb[30].mxu1 %vm1125_vm5, %v1115_v5  ;;  %3536 = vmatmul.mubr.msk.f32.gmra.mrb[28].mxu0 %vm1125_vm5, %v1115_v5 }
 0x11b   : > { %3463 = vmatprep.mubr.msk.f32.mxu1 %vm1125_vm5, %v4389_v21 }
 0x11d   : > { %v806_v30 = vpop.permute.xlu0 %805  ;;  %v808_v0 = vpop.permute.xlu1 %807 }
 0x11e   : > { %3464 = vmatmul.mubr.msk.f32.vlgmr.msra.gmra.mrb[16].mxu1 %vm1125_vm5, %v4386_v11  ;;  %v1079_v19 = vsel %vm1044_vm3, %v4277_v23, %v806_v30  ;;  %v1080_v2 = vsel %vm1044_vm3, %v4274_v22, %v808_v0 }
 0x11f   : > { %3466 = vmatprep.mubr.msk.f32.mxu1 %vm1125_vm5, %v4408_v62 }
 0x121   : > { %v1005_v6 = vpop.permute.xlu0 %1004  ;;  %v1007_v10 = vpop.permute.xlu1 %1006 }
 0x122   : > { %3467 = vmatmul.mubr.msk.f32.gmra.mrb[18].mxu1 %vm1125_vm5, %v4405_v60  ;;  %v1116_v21 = vsel %vm1081_vm4, %v1079_v19, %v1005_v6  ;;  %v1117_v17 = vsel %vm1081_vm4, %v1080_v2, %v1007_v10 }
 0x123   : > { %3469 = vmatprep.mubr.msk.f32.mxu1 %vm1125_vm5, %v4426_v27  ;;  %3538 = vmatprep.mubr.msk.f32.mxu0 %vm1125_vm5, %v1116_v21 }
 0x124   : > { %3539 = vmatmul.mubr.msk.f32.gmra.mrb[30].mxu0 %vm1125_vm5, %v1117_v17 }
 0x126   : > { %3470 = vmatmul.mubr.msk.f32.gmra.mrb[20].mxu1 %vm1125_vm5, %v4423_v25 }
 0x127   : > { %3472 = vmatprep.mubr.msk.f32.mxu1 %vm1125_vm5, %v4447_v34  ;;  %v4575_v34 = vld [vmem:[%s5064_s4] ss:$0 sm:$0xff] }
 0x12a   : > { %3473 = vmatmul.mubr.msk.f32.gmra.mrb[22].mxu1 %vm1125_vm5, %v4444_v32 }
 0x12b   : > { %3475 = vmatprep.mubr.msk.f32.mxu1 %vm1125_vm5, %v4469_v35 }
 0x12e   : > { %3476 = vmatmul.mubr.msk.f32.gmra.mrb[24].mxu1 %vm1125_vm5, %v4466_v29 }
 0x12f   : > { %3478 = vmatprep.mubr.msk.f32.mxu1 %vm1125_vm5, %v1108_v51 }
 0x132   : > { %3479 = vmatmul.mubr.msk.f32.gmra.mrb[26].mxu1 %vm1125_vm5, %v4486_v49  ;;  %v2085_v49 = vshrl.u32 %v2084_v40, 7 }
 0x133   : > { %3481 = vmatprep.mubr.msk.f32.mxu1 %vm1125_vm5, %v1110_v45 }
 0x134   : > { %v4585_v61 = vsub.s32 %v2083_v48, %v2085_v49 }
 0x136   : > { %3482 = vmatmul.mubr.msk.f32.gmra.mrb[28].mxu1 %vm1125_vm5, %v1111_v43 }
 0x137   : > { %3484 = vmatprep.mubr.msk.f32.mxu1 %vm1125_vm5, %v1112_v4 }
 0x13a   : > { %3485 = vmatmul.mubr.msk.f32.gmra.mrb[30].mxu1 %vm1125_vm5, %v1113_v3 }
 0x171   : > { %v3387_v22 = vpop.f32.mrb[0].mxu1 }
 0x172   : > { %v1288_v23 = vpop.f32.mrb[1].mxu1 }
 0x17d   : > { %v3390_v11 = vpop.f32.mrb[2].mxu1 }
 0x17e   : > { %v1298_v60 = vpop.f32.mrb[3].mxu1 }
 0x185   : > { %v3393_v62 = vpop.f32.mrb[4].mxu1 }
 0x186   : > { %v1308_v20 = vpop.f32.mrb[5].mxu1 }
 0x18d   : > { %v3396_v25 = vpop.f32.mrb[6].mxu1 }
 0x18e   : > { %v1318_v27 = vpop.f32.mrb[7].mxu1 }
 0x195   : > { %v4560_v15 = vpop.f32.mrb[8].mxu1 }
 0x196   : > { %v4562_v24 = vpop.f32.mrb[9].mxu1 }
 0x19d   : > { %v4564_v26 = vpop.f32.mrb[10].mxu1 }
 0x19e   : > { %v4566_v28 = vpop.f32.mrb[11].mxu1 }
 0x1a5   : > { %v4568_v16 = vpop.f32.mrb[12].mxu1 }
 0x1a6   : > { %v4570_v18 = vpop.f32.mrb[13].mxu1 }
 0x1a9   : > { %v3495_v32 = vpop.f32.mrb[0].mxu0 }
 0x1aa   : > { %v3557_v50 = vadd.f32 %v3495_v32, %v3387_v22  ;;  %v1754_v55 = vpop.f32.mrb[1].mxu0 }
 0x1ab   : > { %v3558_v37 = vadd.f32 %v1754_v55, %v1288_v23 }
 0x1ac   : > { %v1953_v29 = vadd.f32 %v3557_v50, %v4575_v34 }
 0x1ad   : > { %v1952_v35 = vadd.f32 %v3558_v37, %v4575_v34  ;;  %v4579_v8 = vpop.f32.mrb[14].mxu1  ;;  %v3498_v14 = vpop.f32.mrb[2].mxu0 }
 0x1ae   : > { %v3559_v33 = vadd.f32 %v3498_v14, %v3390_v11  ;;  %v4581_v53 = vpop.f32.mrb[15].mxu1  ;;  %v1764_v42 = vpop.f32.mrb[3].mxu0  ;;  %v1985_v44 = vmax.f32 %v1953_v29, 0.0 }
 0x1af   : > { %v3560_v51 = vadd.f32 %v1764_v42, %v1298_v60  ;;  %v1984_v47 = vmax.f32 %v1952_v35, 0.0 }
 0x1b0   : > { %v1955_v52 = vadd.f32 %v3559_v33, %v4575_v34  ;;  %v2019_v7 = vsel %vm1044_vm3, %v1985_v44, -inf }
 0x1b1   : > { %v1954_v54 = vadd.f32 %v3560_v51, %v4575_v34  ;;  %v3501_v57 = vpop.f32.mrb[4].mxu0  ;;  %v2016_v3 = vsel %vm1044_vm3, %v1984_v47, -inf }
 0x1b2   : > { %v1987_v58 = vmax.f32 %v1955_v52, 0.0  ;;  %v3561_v43 = vadd.f32 %v3501_v57, %v3393_v62  ;;  %v1774_v45 = vpop.f32.mrb[5].mxu0 }
 0x1b3   : > { %v1986_v9 = vmax.f32 %v1954_v54, 0.0  ;;  %v3562_v63 = vadd.f32 %v1774_v45, %v1308_v20 }
 0x1b4   : > { %v2020_v12 = vsel %vm1044_vm3, %v1987_v58, -inf  ;;  %v4590_v1 = vadd.f32 %v3561_v43, %v4575_v34 }
 0x1b5   : > { %v2021_v4 = vmax.f32 %v2019_v7, %v2020_v12  ;;  %v2017_v36 = vsel %vm1044_vm3, %v1986_v9, -inf  ;;  %v4595_v38 = vadd.f32 %v3562_v63, %v4575_v34  ;;  %v3504_v41 = vpop.f32.mrb[6].mxu0 }
 0x1b6   : > { %v2018_v46 = vmax.f32 %v2016_v3, %v2017_v36  ;;  %v3563_v31 = vadd.f32 %v3504_v41, %v3396_v25  ;;  %v1784_v56 = vpop.f32.mrb[7].mxu0  ;;  %v1989_v2 = vmax.f32 %v4590_v1, 0.0 }
 0x1b7   : > { %v2097_v5 = vcombine.high %v2021_v4, %v2021_v4  ;;  %v2104_v59 = vrot.slane %v2021_v4, %v4585_v61  ;;  %v4598_v30 = vadd.f32 %v1784_v56, %v1318_v27  ;;  %v1988_v6 = vmax.f32 %v4595_v38, 0.0 }
 0x1b8   : > { %v2080_v0 = vcombine.high %v2018_v46, %v2018_v46  ;;  %v2087_v19 = vrot.slane %v2018_v46, %v4585_v61  ;;  %v4606_v22 = vadd.f32 %v3563_v31, %v4575_v34 }
 0x1b9   : > { %v2111_v10 = vrot.slane %v2097_v5, %v4585_v61  ;;  %v2112_v21 = vcombine.high %v2104_v59, %v2104_v59  ;;  %v2445_v17 = vsel %vm2416_vm6, %v2104_v59, -inf  ;;  %v4608_v23 = vpop.f32.mrb[8].mxu0 }
 0x1ba   : > { %v2446_v11 = vrot.slane %v2445_v17, 4  ;;  %v2094_v60 = vrot.slane %v2080_v0, %v4585_v61  ;;  %v2095_v62 = vcombine.high %v2087_v19, %v2087_v19  ;;  %v2417_v20 = vsel %vm2416_vm6, %v2087_v19, -inf  ;;  %v4612_v25 = vpop.f32.mrb[9].mxu0 }
 0x1bb   : > { %v2113_v27 = vcombine.high %v2111_v10, %v2111_v10  ;;  %v2452_v32 = vsel %vm2416_vm6, %v2112_v21, -inf  ;;  %v2459_v50 = vsel %vm2416_vm6, %v2111_v10, -inf  ;;  %v2418_v55 = vrot.slane %v2417_v20, 4 }
 0x1bc   : > { %v2447_v37 = vmax.f32 %v2445_v17, %v2446_v11  ;;  %v2453_v39 = vrot.slane %v2452_v32, 4  ;;  %v2460_v13 = vrot.slane %v2459_v50, 4  ;;  %v2096_v40 = vcombine.high %v2094_v60, %v2094_v60 }
 0x1bd   : > { %v2466_v29 = vsel %vm2416_vm6, %v2113_v27, -inf  ;;  %v2419_v35 = vmax.f32 %v2417_v20, %v2418_v55  ;;  %v2424_v14 = vsel %vm2416_vm6, %v2095_v62, -inf  ;;  %v2431_v33 = vsel %vm2416_vm6, %v2094_v60, -inf  ;;  %v4619_v42 = vpop.f32.mrb[10].mxu0 }
 0x1be   : > { %v2448_v48 = vrot.slane %v2447_v37, 2  ;;  %v2454_v49 = vmax.f32 %v2452_v32, %v2453_v39  ;;  %v2461_v51 = vmax.f32 %v2459_v50, %v2460_v13  ;;  %v2467_v44 = vrot.slane %v2466_v29, 4  ;;  %v4621_v52 = vpop.f32.mrb[11].mxu0 }
 0x1bf   : > { %v2420_v47 = vrot.slane %v2419_v35, 2  ;;  %v2425_v54 = vrot.slane %v2424_v14, 4  ;;  %v2432_v57 = vrot.slane %v2431_v33, 4  ;;  %v2438_v58 = vsel %vm2416_vm6, %v2096_v40, -inf }
 0x1c0   : > { %v2449_v43 = vmax.f32 %v2447_v37, %v2448_v48  ;;  %v2455_v45 = vrot.slane %v2454_v49, 2  ;;  %v2462_v9 = vrot.slane %v2461_v51, 2  ;;  %v2468_v63 = vmax.f32 %v2466_v29, %v2467_v44 }
 0x1c1   : > { %v2421_v7 = vmax.f32 %v2419_v35, %v2420_v47  ;;  %v2426_v12 = vmax.f32 %v2424_v14, %v2425_v54  ;;  %v2433_v1 = vmax.f32 %v2431_v33, %v2432_v57  ;;  %v2439_v3 = vrot.slane %v2438_v58, 4  ;;  %v4624_v4 = vpop.f32.mrb[12].mxu0 }
 0x1c2   : > { %v2450_v36 = vrot.slane %v2449_v43, 1  ;;  %v2456_v38 = vmax.f32 %v2454_v49, %v2455_v45  ;;  %v2463_v41 = vmax.f32 %v2461_v51, %v2462_v9  ;;  %v2469_v46 = vrot.slane %v2468_v63, 2  ;;  %v4626_v31 = vpop.f32.mrb[13].mxu0 }
 0x1c3   : > { %v2422_v56 = vrot.slane %v2421_v7, 1  ;;  %v2427_v5 = vrot.slane %v2426_v12, 2  ;;  %v2434_v59 = vrot.slane %v2433_v1, 2  ;;  %v2440_v0 = vmax.f32 %v2438_v58, %v2439_v3 }
 0x1c4   : > { %v2457_v19 = vrot.slane %v2456_v38, 1  ;;  %v2470_v10 = vmax.f32 %v2468_v63, %v2469_v46  ;;  %v2025_v21 = vsel %vm1044_vm3, %v1989_v2, -inf  ;;  %v2022_v17 = vsel %vm1044_vm3, %v1988_v6, -inf }
 0x1c5   : > { %v2451_v11 = vmax.f32 %v2449_v43, %v2450_v36  ;;  %v2428_v60 = vmax.f32 %v2426_v12, %v2427_v5  ;;  %v2435_v62 = vmax.f32 %v2433_v1, %v2434_v59  ;;  %v2441_v20 = vrot.slane %v2440_v0, 2  ;;  %v4630_v27 = vpop.f32.mrb[14].mxu0 }
 0x1c6   : > { %v2458_v32 = vmax.f32 %v2456_v38, %v2457_v19  ;;  %v2464_v50 = vrot.slane %v2463_v41, 1  ;;  %v2423_v55 = vmax.f32 %v2421_v7, %v2422_v56  ;;  %v1991_v37 = vmax.f32 %v4606_v22, 0.0  ;;  %v4633_v39 = vpop.f32.mrb[15].mxu0 }
 0x1c7   : > { %v2429_v13 = vrot.slane %v2428_v60, 1  ;;  %v2436_v2 = vrot.slane %v2435_v62, 1  ;;  %v2442_v40 = vmax.f32 %v2440_v0, %v2441_v20  ;;  %v1958_v6 = vadd.f32 %v4598_v30, %v4575_v34 }
 0x1c8   : > { %v2471_v29 = vrot.slane %v2470_v10, 1  ;;  %v2026_v35 = vsel %vm1044_vm3, %v1991_v37, -inf  ;;  %v3565_v14 = vadd.f32 %v4608_v23, %v4560_v15  ;;  %v3566_v33 = vadd.f32 %v4612_v25, %v4562_v24 }
 0x1c9   : > { %v2430_v22 = vmax.f32 %v2428_v60, %v2429_v13  ;;  %v2437_v48 = vmax.f32 %v2435_v62, %v2436_v2  ;;  %v2443_v49 = vrot.slane %v2442_v40, 1  ;;  %v2027_v51 = vmax.f32 %v2025_v21, %v2026_v35  ;;  %v4643_v44 = vpop.f32.mrb[16].mxu0 }
 0x1ca   : > { %v2465_v47 = vmax.f32 %v2463_v41, %v2464_v50  ;;  %v1990_v54 = vmax.f32 %v1958_v6, 0.0  ;;  %v4646_v30 = vadd.f32 %v3565_v14, %v4575_v34  ;;  %v4650_v57 = vadd.f32 %v4619_v42, %v4564_v26  ;;  %v4652_v15 = vpop.f32.mrb[17].mxu0 }
 0x1cb   : > { %v2444_v24 = vmax.f32 %v2442_v40, %v2443_v49  ;;  %v2930_v23 = vsel %vm2929_vm7, %v2430_v22, %v2423_v55  ;;  %v2131_v25 = vcombine.high %v2027_v51, %v2027_v51  ;;  %v2138_v58 = vrot.slane %v2027_v51, %v4585_v61 }
 0x1cc   : > { %v2472_v43 = vmax.f32 %v2470_v10, %v2471_v29  ;;  %v2932_v45 = vsel %vm2931_vm8, %v2437_v48, %v2930_v23  ;;  %v2023_v9 = vsel %vm1044_vm3, %v1990_v54, -inf  ;;  %v1960_v63 = vadd.f32 %v3566_v33, %v4575_v34 }
 0x1cd   : > { %v2934_v26 = vsel %vm2933_vm9, %v2444_v24, %v2932_v45  ;;  %v2145_v42 = vrot.slane %v2131_v25, %v4585_v61  ;;  %v2146_v7 = vcombine.high %v2138_v58, %v2138_v58  ;;  %v2501_v12 = vsel %vm2416_vm6, %v2138_v58, -inf  ;;  %v4664_v1 = vpop.f32.mrb[18].mxu0 }
 0x1ce   : > { %v2936_v3 = vsel %vm2935_vm10, %v2451_v11, %v2934_v26  ;;  %v2502_v36 = vrot.slane %v2501_v12, 4  ;;  %v2024_v38 = vmax.f32 %v2022_v17, %v2023_v9  ;;  %v1993_v41 = vmax.f32 %v4646_v30, 0.0  ;;  %v4668_v46 = vpop.f32.mrb[19].mxu0 }
 0x1cf   : > { %v2938_v56 = vsel %vm2937_vm11, %v2458_v32, %v2936_v3  ;;  %v2147_v5 = vcombine.high %v2145_v42, %v2145_v42  ;;  %v2508_v59 = vsel %vm2416_vm6, %v2146_v7, -inf  ;;  %v2515_v0 = vsel %vm2416_vm6, %v2145_v42, -inf }
 0x1d0   : > { %v2940_v19 = vsel %vm2939_vm12, %v2465_v47, %v2938_v56  ;;  %v2503_v10 = vmax.f32 %v2501_v12, %v2502_v36  ;;  %v2509_v21 = vrot.slane %v2508_v59, 4  ;;  %v2516_v60 = vrot.slane %v2515_v0, 4 }
 0x1d1   : > { %v2942_v11 = vsel %vm2941_vm13, %v2472_v43, %v2940_v19  ;;  %v2522_v17 = vsel %vm2416_vm6, %v2147_v5, -inf  ;;  %v2114_v62 = vcombine.high %v2024_v38, %v2024_v38  ;;  %v2121_v20 = vrot.slane %v2024_v38, %v4585_v61  ;;  %v4677_v50 = vpop.f32.mrb[20].mxu0 }
 0x1d2   : > { %3000 = vst.msk [vmem:[%s4679_s16] sm:$0xff] %vm1044_vm3, %v2942_v11  ;;  %v2504_v32 = vrot.slane %v2503_v10, 2  ;;  %v2510_v55 = vmax.f32 %v2508_v59, %v2509_v21  ;;  %v2517_v37 = vmax.f32 %v2515_v0, %v2516_v60  ;;  %v2523_v13 = vrot.slane %v2522_v17, 4  ;;  %v4683_v2 = vpop.f32.mrb[21].mxu0 }
 0x1d3   : > { %v2128_v40 = vrot.slane %v2114_v62, %v4585_v61  ;;  %v2129_v6 = vcombine.high %v2121_v20, %v2121_v20  ;;  %v2473_v29 = vsel %vm2416_vm6, %v2121_v20, -inf  ;;  %v1992_v35 = vmax.f32 %v1960_v63, 0.0 }
 0x1d4   : > { %v2505_v14 = vmax.f32 %v2503_v10, %v2504_v32  ;;  %v2511_v33 = vrot.slane %v2510_v55, 2  ;;  %v2518_v22 = vrot.slane %v2517_v37, 2  ;;  %v2524_v48 = vmax.f32 %v2522_v17, %v2523_v13 }
 0x1d5   : > { %v2130_v49 = vcombine.high %v2128_v40, %v2128_v40  ;;  %v2474_v51 = vrot.slane %v2473_v29, 4  ;;  %v2480_v47 = vsel %vm2416_vm6, %v2129_v6, -inf  ;;  %v2487_v54 = vsel %vm2416_vm6, %v2128_v40, -inf  ;;  %v4689_v30 = vpop.f32.mrb[22].mxu0 }
 0x1d6   : > { %v2506_v24 = vrot.slane %v2505_v14, 1  ;;  %v2512_v23 = vmax.f32 %v2510_v55, %v2511_v33  ;;  %v2519_v25 = vmax.f32 %v2517_v37, %v2518_v22  ;;  %v2525_v58 = vrot.slane %v2524_v48, 2  ;;  %v4691_v43 = vpop.f32.mrb[23].mxu0 }
 0x1d7   : > { %v2475_v45 = vmax.f32 %v2473_v29, %v2474_v51  ;;  %v2481_v9 = vrot.slane %v2480_v47, 4  ;;  %v2488_v63 = vrot.slane %v2487_v54, 4  ;;  %v2494_v26 = vsel %vm2416_vm6, %v2130_v49, -inf }
 0x1d8   : > { %v2513_v42 = vrot.slane %v2512_v23, 1  ;;  %v2526_v7 = vmax.f32 %v2524_v48, %v2525_v58  ;;  %v2031_v12 = vsel %vm1044_vm3, %v1993_v41, -inf  ;;  %v2028_v3 = vsel %vm1044_vm3, %v1992_v35, -inf }
 0x1d9   : > { %v2476_v36 = vrot.slane %v2475_v45, 2  ;;  %v2482_v38 = vmax.f32 %v2480_v47, %v2481_v9  ;;  %v2489_v56 = vmax.f32 %v2487_v54, %v2488_v63  ;;  %v2495_v5 = vrot.slane %v2494_v26, 4 }
 0x1da   : > { %v2507_v59 = vmax.f32 %v2505_v14, %v2506_v24  ;;  %v2514_v0 = vmax.f32 %v2512_v23, %v2513_v42  ;;  %v2520_v19 = vrot.slane %v2519_v25, 1  ;;  %v1963_v10 = vadd.f32 %v4650_v57, %v4575_v34 }
 0x1db   : > { %v2477_v21 = vmax.f32 %v2475_v45, %v2476_v36  ;;  %v2483_v60 = vrot.slane %v2482_v38, 2  ;;  %v2490_v11 = vrot.slane %v2489_v56, 2  ;;  %v2496_v17 = vmax.f32 %v2494_v26, %v2495_v5 }
 0x1dc   : > { %v2527_v62 = vrot.slane %v2526_v7, 1  ;;  %v1995_v20 = vmax.f32 %v1963_v10, 0.0  ;;  %v3568_v41 = vadd.f32 %v4621_v52, %v4566_v28  ;;  %v3569_v32 = vadd.f32 %v4624_v4, %v4568_v16 }
 0x1dd   : > { %v2478_v55 = vrot.slane %v2477_v21, 1  ;;  %v2484_v37 = vmax.f32 %v2482_v38, %v2483_v60  ;;  %v2491_v13 = vmax.f32 %v2489_v56, %v2490_v11  ;;  %v2497_v40 = vrot.slane %v2496_v17, 2  ;;  %v4702_v6 = vpop.f32.mrb[24].mxu0 }
 0x1de   : > { %v2032_v57 = vsel %vm1044_vm3, %v1995_v20, -inf  ;;  %v1962_v29 = vadd.f32 %v3568_v41, %v4575_v34  ;;  %v4707_v35 = vadd.f32 %v3569_v32, %v4575_v34  ;;  %v3570_v14 = vadd.f32 %v4626_v31, %v4570_v18  ;;  %v4711_v28 = vpop.f32.mrb[25].mxu0 }
 0x1df   : > { %v2521_v52 = vmax.f32 %v2519_v25, %v2520_v19  ;;  %v2485_v16 = vrot.slane %v2484_v37, 1  ;;  %v2492_v4 = vrot.slane %v2491_v13, 1  ;;  %v2498_v33 = vmax.f32 %v2496_v17, %v2497_v40 }
 0x1e0   : > { %v2528_v22 = vmax.f32 %v2526_v7, %v2527_v62  ;;  %v2479_v48 = vmax.f32 %v2477_v21, %v2478_v55  ;;  %v2033_v49 = vmax.f32 %v2031_v12, %v2032_v57  ;;  %v1994_v51 = vmax.f32 %v1962_v29, 0.0 }
 0x1e1   : > { %v2486_v47 = vmax.f32 %v2484_v37, %v2485_v16  ;;  %v2493_v54 = vmax.f32 %v2491_v13, %v2492_v4  ;;  %v2499_v24 = vrot.slane %v2498_v33, 1  ;;  %v4715_v23 = vadd.f32 %v4630_v27, %v4579_v8 }
 0x1e2   : > { %v2165_v58 = vcombine.high %v2033_v49, %v2033_v49  ;;  %v2172_v18 = vrot.slane %v2033_v49, %v4585_v61  ;;  %v2029_v31 = vsel %vm1044_vm3, %v1994_v51, -inf  ;;  %v1997_v25 = vmax.f32 %v4707_v35, 0.0 }
 0x1e3   : > { %v2500_v45 = vmax.f32 %v2498_v33, %v2499_v24  ;;  %v2943_v9 = vsel %vm2929_vm7, %v2486_v47, %v2479_v48  ;;  %v2030_v63 = vmax.f32 %v2028_v3, %v2029_v31  ;;  %v4722_v26 = vadd.f32 %v3570_v14, %v4575_v34 }
 0x1e4   : > { %v2944_v42 = vsel %vm2931_vm8, %v2493_v54, %v2943_v9  ;;  %v2179_v7 = vrot.slane %v2165_v58, %v4585_v61  ;;  %v2180_v8 = vcombine.high %v2172_v18, %v2172_v18  ;;  %v2557_v27 = vsel %vm2416_vm6, %v2172_v18, -inf }
 0x1e5   : > { %v2945_v12 = vsel %vm2933_vm9, %v2500_v45, %v2944_v42  ;;  %v2558_v36 = vrot.slane %v2557_v27, 4  ;;  %v2148_v38 = vcombine.high %v2030_v63, %v2030_v63  ;;  %v2155_v56 = vrot.slane %v2030_v63, %v4585_v61  ;;  %v4729_v5 = vpop.f32.mrb[26].mxu0 }
 0x1e6   : > { %v2946_v3 = vsel %vm2935_vm10, %v2507_v59, %v2945_v12  ;;  %v2181_v19 = vcombine.high %v2179_v7, %v2179_v7  ;;  %v2564_v10 = vsel %vm2416_vm6, %v2180_v8, -inf  ;;  %v2571_v21 = vsel %vm2416_vm6, %v2179_v7, -inf  ;;  %v4734_v60 = vpop.f32.mrb[27].mxu0 }
 0x1e7   : > { %v2947_v11 = vsel %vm2937_vm11, %v2514_v0, %v2946_v3  ;;  %v2559_v17 = vmax.f32 %v2557_v27, %v2558_v36  ;;  %v2565_v62 = vrot.slane %v2564_v10, 4  ;;  %v2572_v20 = vrot.slane %v2571_v21, 4 }
 0x1e8   : > { %v2948_v41 = vsel %vm2939_vm12, %v2521_v52, %v2947_v11  ;;  %v2578_v32 = vsel %vm2416_vm6, %v2181_v19, -inf  ;;  %v2162_v55 = vrot.slane %v2148_v38, %v4585_v61  ;;  %v2163_v59 = vcombine.high %v2155_v56, %v2155_v56 }
 0x1e9   : > { %v2949_v37 = vsel %vm2941_vm13, %v2528_v22, %v2948_v41  ;;  %v2560_v13 = vrot.slane %v2559_v17, 2  ;;  %v2566_v40 = vmax.f32 %v2564_v10, %v2565_v62  ;;  %v2573_v57 = vmax.f32 %v2571_v21, %v2572_v20 }
 0x1ea   : > { %3001 = vst.msk [vmem:[%s4679_s16 + $0x8] sm:$0xff] %vm1044_vm3, %v2949_v37  ;;  %v2579_v29 = vrot.slane %v2578_v32, 4  ;;  %v2164_v35 = vcombine.high %v2162_v55, %v2162_v55  ;;  %v2529_v0 = vsel %vm2416_vm6, %v2155_v56, -inf  ;;  %v2536_v14 = vsel %vm2416_vm6, %v2163_v59, -inf }
 0x1eb   : > { %v2561_v16 = vmax.f32 %v2559_v17, %v2560_v13  ;;  %v2567_v52 = vrot.slane %v2566_v40, 2  ;;  %v2574_v4 = vrot.slane %v2573_v57, 2  ;;  %v2530_v33 = vrot.slane %v2529_v0, 4 }
 0x1ec   : > { %v2580_v48 = vmax.f32 %v2578_v32, %v2579_v29  ;;  %v2537_v49 = vrot.slane %v2536_v14, 4  ;;  %v2543_v51 = vsel %vm2416_vm6, %v2162_v55, -inf  ;;  %v2550_v22 = vsel %vm2416_vm6, %v2164_v35, -inf }
 0x1ed   : > { %v2562_v47 = vrot.slane %v2561_v16, 1  ;;  %v2568_v54 = vmax.f32 %v2566_v40, %v2567_v52  ;;  %v2575_v24 = vmax.f32 %v2573_v57, %v2574_v4  ;;  %v2531_v58 = vmax.f32 %v2529_v0, %v2530_v33  ;;  %v4747_v18 = vpop.f32.mrb[28].mxu0 }
 0x1ee   : > { %v2581_v31 = vrot.slane %v2580_v48, 2  ;;  %v2538_v45 = vmax.f32 %v2536_v14, %v2537_v49  ;;  %v2544_v9 = vrot.slane %v2543_v51, 4  ;;  %v2551_v63 = vrot.slane %v2550_v22, 4  ;;  %v4749_v42 = vpop.f32.mrb[29].mxu0 }
 0x1ef   : > { %v2569_v7 = vrot.slane %v2568_v54, 1  ;;  %v2576_v8 = vrot.slane %v2575_v24, 1  ;;  %v2532_v27 = vrot.slane %v2531_v58, 2  ;;  %v2037_v12 = vsel %vm1044_vm3, %v1997_v25, -inf }
 0x1f0   : > { %v2582_v36 = vmax.f32 %v2580_v48, %v2581_v31  ;;  %v2539_v38 = vrot.slane %v2538_v45, 2  ;;  %v2545_v56 = vmax.f32 %v2543_v51, %v2544_v9  ;;  %v2552_v3 = vmax.f32 %v2550_v22, %v2551_v63 }
 0x1f1   : > { %v2563_v19 = vmax.f32 %v2561_v16, %v2562_v47  ;;  %v2570_v10 = vmax.f32 %v2568_v54, %v2569_v7  ;;  %v2533_v21 = vmax.f32 %v2531_v58, %v2532_v27  ;;  %v1996_v11 = vmax.f32 %v4722_v26, 0.0  ;;  %v3465_v17 = vpop.f32.mrb[16].mxu1 }
 0x1f2   : > { %v2577_v62 = vmax.f32 %v2575_v24, %v2576_v8  ;;  %v2540_v20 = vmax.f32 %v2538_v45, %v2539_v38  ;;  %v2546_v41 = vrot.slane %v2545_v56, 2  ;;  %v2553_v32 = vrot.slane %v2552_v3, 2  ;;  %v1599_v55 = vpop.f32.mrb[17].mxu1 }
 0x1f3   : > { %v2534_v59 = vrot.slane %v2533_v21, 1  ;;  %v1967_v37 = vadd.f32 %v4715_v23, %v4575_v34  ;;  %v3572_v25 = vadd.f32 %v4633_v39, %v4581_v53  ;;  %v3573_v13 = vadd.f32 %v4643_v44, %v3465_v17 }
 0x1f4   : > { %v2583_v40 = vrot.slane %v2582_v36, 1  ;;  %v2541_v57 = vrot.slane %v2540_v20, 1  ;;  %v2547_v29 = vmax.f32 %v2545_v56, %v2546_v41  ;;  %v2554_v35 = vmax.f32 %v2552_v3, %v2553_v32 }
 0x1f5   : > { %v2535_v26 = vmax.f32 %v2533_v21, %v2534_v59  ;;  %v1999_v0 = vmax.f32 %v1967_v37, 0.0  ;;  %v1966_v14 = vadd.f32 %v3572_v25, %v4575_v34  ;;  %v4760_v16 = vadd.f32 %v3573_v13, %v4575_v34  ;;  %v3468_v52 = vpop.f32.mrb[18].mxu1 }
 0x1f6   : > { %v2542_v4 = vmax.f32 %v2540_v20, %v2541_v57  ;;  %v2548_v33 = vrot.slane %v2547_v29, 1  ;;  %v2555_v23 = vrot.slane %v2554_v35, 1  ;;  %v3574_v48 = vadd.f32 %v4652_v15, %v1599_v55  ;;  %v1609_v53 = vpop.f32.mrb[19].mxu1 }
 0x1f7   : > { %v2034_v39 = vsel %vm1044_vm3, %v1996_v11, -inf  ;;  %v2038_v44 = vsel %vm1044_vm3, %v1999_v0, -inf  ;;  %v1998_v49 = vmax.f32 %v1966_v14, 0.0  ;;  %v3575_v51 = vadd.f32 %v4664_v1, %v3468_v52  ;;  %v4766_v22 = vpop.f32.mrb[30].mxu0 }
 0x1f8   : > { %v2549_v47 = vmax.f32 %v2547_v29, %v2548_v33  ;;  %v2556_v54 = vmax.f32 %v2554_v35, %v2555_v23  ;;  %v2950_v24 = vsel %vm2929_vm7, %v2542_v4, %v2535_v26  ;;  %v2039_v58 = vmax.f32 %v2037_v12, %v2038_v44  ;;  %v4769_v31 = vpop.f32.mrb[31].mxu0 }
 0x1f9   : > { %v2584_v45 = vmax.f32 %v2582_v36, %v2583_v40  ;;  %v2035_v15 = vsel %vm1044_vm3, %v1998_v49, -inf  ;;  %v2001_v9 = vmax.f32 %v4760_v16, 0.0  ;;  %v4774_v63 = vadd.f32 %v3574_v48, %v4575_v34  ;;  %v4776_v7 = vpop.f32.mrb[20].mxu1 }
 0x1fa   : > { %v2951_v1 = vsel %vm2931_vm8, %v2549_v47, %v2950_v24  ;;  %v2199_v8 = vcombine.high %v2039_v58, %v2039_v58  ;;  %v2206_v27 = vrot.slane %v2039_v58, %v4585_v61  ;;  %v2036_v38 = vmax.f32 %v2034_v39, %v2035_v15  ;;  %v4780_v56 = vpop.f32.mrb[21].mxu1 }
 0x1fb   : > { %v2952_v12 = vsel %vm2933_vm9, %v2556_v54, %v2951_v1  ;;  %v2000_v36 = vmax.f32 %v4774_v63, 0.0  ;;  %v4785_v3 = vadd.f32 %v3575_v51, %v4575_v34  ;;  %v4788_v21 = vadd.f32 %v4668_v46, %v1609_v53 }
 0x1fc   : > { %v2953_v11 = vsel %vm2935_vm10, %v2563_v19, %v2952_v12  ;;  %v2213_v17 = vrot.slane %v2199_v8, %v4585_v61  ;;  %v2214_v20 = vcombine.high %v2206_v27, %v2206_v27  ;;  %v2613_v41 = vsel %vm2416_vm6, %v2206_v27, -inf }
 0x1fd   : > { %v2954_v32 = vsel %vm2937_vm11, %v2570_v10, %v2953_v11  ;;  %v2614_v55 = vrot.slane %v2613_v41, 4  ;;  %v2182_v59 = vcombine.high %v2036_v38, %v2036_v38  ;;  %v2189_v37 = vrot.slane %v2036_v38, %v4585_v61  ;;  %v4795_v25 = vpop.f32.mrb[22].mxu1 }
 0x1fe   : > { %v2955_v13 = vsel %vm2939_vm12, %v2577_v62, %v2954_v32  ;;  %v2215_v46 = vcombine.high %v2213_v17, %v2213_v17  ;;  %v2620_v40 = vsel %vm2416_vm6, %v2214_v20, -inf  ;;  %v2627_v19 = vsel %vm2416_vm6, %v2213_v17, -inf  ;;  %v4800_v57 = vpop.f32.mrb[23].mxu1 }
 0x1ff   : > { %v2956_v29 = vsel %vm2941_vm13, %v2584_v45, %v2955_v13  ;;  %v2615_v35 = vmax.f32 %v2613_v41, %v2614_v55  ;;  %v2621_v26 = vrot.slane %v2620_v40, 4  ;;  %v2628_v10 = vrot.slane %v2627_v19, 4 }
 0x200   : > { %3002 = vst.msk [vmem:[%s4679_s16 + $0x10] sm:$0xff] %vm1044_vm3, %v2956_v29  ;;  %v2634_v0 = vsel %vm2416_vm6, %v2215_v46, -inf  ;;  %v2196_v14 = vrot.slane %v2182_v59, %v4585_v61  ;;  %v2197_v52 = vcombine.high %v2189_v37, %v2189_v37  ;;  %v2585_v62 = vsel %vm2416_vm6, %v2189_v37, -inf }
 0x201   : > { %v2616_v4 = vrot.slane %v2615_v35, 2  ;;  %v2622_v33 = vmax.f32 %v2620_v40, %v2621_v26  ;;  %v2629_v23 = vmax.f32 %v2627_v19, %v2628_v10  ;;  %v2635_v48 = vrot.slane %v2634_v0, 4  ;;  %v4808_v53 = vpop.f32.mrb[24].mxu1 }
 0x202   : > { %v2198_v39 = vcombine.high %v2196_v14, %v2196_v14  ;;  %v2586_v44 = vrot.slane %v2585_v62, 4  ;;  %v2592_v49 = vsel %vm2416_vm6, %v2197_v52, -inf  ;;  %v2599_v51 = vsel %vm2416_vm6, %v2196_v14, -inf  ;;  %v4812_v47 = vpop.f32.mrb[25].mxu1 }
 0x203   : > { %v2617_v54 = vmax.f32 %v2615_v35, %v2616_v4  ;;  %v2623_v24 = vrot.slane %v2622_v33, 2  ;;  %v2630_v58 = vrot.slane %v2629_v23, 2  ;;  %v2636_v45 = vmax.f32 %v2634_v0, %v2635_v48 }
 0x204   : > { %v2587_v15 = vmax.f32 %v2585_v62, %v2586_v44  ;;  %v2593_v1 = vrot.slane %v2592_v49, 4  ;;  %v2600_v8 = vrot.slane %v2599_v51, 4  ;;  %v2606_v27 = vsel %vm2416_vm6, %v2198_v39, -inf }
 0x205   : > { %v2618_v38 = vrot.slane %v2617_v54, 1  ;;  %v2624_v12 = vmax.f32 %v2622_v33, %v2623_v24  ;;  %v2631_v11 = vmax.f32 %v2629_v23, %v2630_v58  ;;  %v2637_v17 = vrot.slane %v2636_v45, 2  ;;  %v4815_v20 = vpop.f32.mrb[26].mxu1 }
 0x206   : > { %v2588_v41 = vrot.slane %v2587_v15, 2  ;;  %v2594_v32 = vmax.f32 %v2592_v49, %v2593_v1  ;;  %v2601_v55 = vmax.f32 %v2599_v51, %v2600_v8  ;;  %v2607_v59 = vrot.slane %v2606_v27, 4  ;;  %v4817_v37 = vpop.f32.mrb[27].mxu1 }
 0x207   : > { %v2625_v13 = vrot.slane %v2624_v12, 1  ;;  %v2632_v46 = vrot.slane %v2631_v11, 1  ;;  %v2638_v40 = vmax.f32 %v2636_v45, %v2637_v17  ;;  %v2003_v19 = vmax.f32 %v4785_v3, 0.0 }
 0x208   : > { %v2589_v29 = vmax.f32 %v2587_v15, %v2588_v41  ;;  %v2595_v35 = vrot.slane %v2594_v32, 2  ;;  %v2602_v26 = vrot.slane %v2601_v55, 2  ;;  %v2608_v10 = vmax.f32 %v2606_v27, %v2607_v59 }
 0x209   : > { %v2619_v0 = vmax.f32 %v2617_v54, %v2618_v38  ;;  %v2626_v14 = vmax.f32 %v2624_v12, %v2625_v13  ;;  %v2633_v52 = vmax.f32 %v2631_v11, %v2632_v46  ;;  %v2043_v62 = vsel %vm1044_vm3, %v2001_v9, -inf  ;;  %v4823_v4 = vpop.f32.mrb[28].mxu1 }
 0x20a   : > { %v2590_v33 = vrot.slane %v2589_v29, 1  ;;  %v2596_v23 = vmax.f32 %v2594_v32, %v2595_v35  ;;  %v2603_v48 = vmax.f32 %v2601_v55, %v2602_v26  ;;  %v2609_v39 = vrot.slane %v2608_v10, 2  ;;  %v4825_v44 = vpop.f32.mrb[29].mxu1 }
 0x20b   : > { %v2639_v3 = vrot.slane %v2638_v40, 1  ;;  %v2044_v49 = vsel %vm1044_vm3, %v2003_v19, -inf  ;;  %v1970_v51 = vadd.f32 %v4788_v21, %v4575_v34  ;;  %v3577_v54 = vadd.f32 %v4677_v50, %v4776_v7 }
 0x20c   : > { %v2597_v16 = vrot.slane %v2596_v23, 1  ;;  %v2604_v24 = vrot.slane %v2603_v48, 1  ;;  %v2610_v9 = vmax.f32 %v2608_v10, %v2609_v39  ;;  %v2040_v58 = vsel %vm1044_vm3, %v2000_v36, -inf }
 0x20d   : > { %v2591_v45 = vmax.f32 %v2589_v29, %v2590_v33  ;;  %v2045_v15 = vmax.f32 %v2043_v62, %v2044_v49  ;;  %v2002_v1 = vmax.f32 %v1970_v51, 0.0  ;;  %v4837_v8 = vadd.f32 %v4683_v2, %v4780_v56  ;;  %v4839_v27 = vpop.f32.mrb[30].mxu1 }
 0x20e   : > { %v2598_v21 = vmax.f32 %v2596_v23, %v2597_v16  ;;  %v2605_v38 = vmax.f32 %v2603_v48, %v2604_v24  ;;  %v2611_v12 = vrot.slane %v2610_v9, 1  ;;  %v4843_v50 = vadd.f32 %v4689_v30, %v4795_v25  ;;  %v4845_v7 = vpop.f32.mrb[31].mxu1 }
 0x20f   : > { %v2640_v63 = vmax.f32 %v2638_v40, %v2639_v3  ;;  %v2233_v36 = vcombine.high %v2045_v15, %v2045_v15  ;;  %v2240_v11 = vrot.slane %v2045_v15, %v4585_v61  ;;  %v2041_v17 = vsel %vm1044_vm3, %v2002_v1, -inf }
 0x210   : > { %v2612_v41 = vmax.f32 %v2610_v9, %v2611_v12  ;;  %v2957_v2 = vsel %vm2929_vm7, %v2598_v21, %v2591_v45  ;;  %v2042_v56 = vmax.f32 %v2040_v58, %v2041_v17  ;;  %v4851_v32 = vadd.f32 %v3577_v54, %v4575_v34 }
 0x211   : > { %v2958_v55 = vsel %vm2931_vm8, %v2605_v38, %v2957_v2  ;;  %v2247_v30 = vrot.slane %v2233_v36, %v4585_v61  ;;  %v2248_v25 = vcombine.high %v2240_v11, %v2240_v11  ;;  %v2669_v59 = vsel %vm2416_vm6, %v2240_v11, -inf }
 0x212   : > { %v2959_v13 = vsel %vm2933_vm9, %v2612_v41, %v2958_v55  ;;  %v2670_v46 = vrot.slane %v2669_v59, 4  ;;  %v2216_v40 = vcombine.high %v2042_v56, %v2042_v56  ;;  %v2223_v19 = vrot.slane %v2042_v56, %v4585_v61 }
 0x213   : > { %v2960_v29 = vsel %vm2935_vm10, %v2619_v0, %v2959_v13  ;;  %v2249_v35 = vcombine.high %v2247_v30, %v2247_v30  ;;  %v2676_v26 = vsel %vm2416_vm6, %v2248_v25, -inf  ;;  %v2683_v10 = vsel %vm2416_vm6, %v2247_v30, -inf }
 0x214   : > { %v2961_v62 = vsel %vm2937_vm11, %v2626_v14, %v2960_v29  ;;  %v2671_v33 = vmax.f32 %v2669_v59, %v2670_v46  ;;  %v2677_v23 = vrot.slane %v2676_v26, 4  ;;  %v2684_v48 = vrot.slane %v2683_v10, 4 }
 0x215   : > { %v2962_v39 = vsel %vm2939_vm12, %v2633_v52, %v2961_v62  ;;  %v2690_v3 = vsel %vm2416_vm6, %v2249_v35, -inf  ;;  %v2230_v49 = vrot.slane %v2216_v40, %v4585_v61  ;;  %v2231_v51 = vcombine.high %v2223_v19, %v2223_v19 }
 0x216   : > { %v2963_v0 = vsel %vm2941_vm13, %v2640_v63, %v2962_v39  ;;  %v2672_v54 = vrot.slane %v2671_v33, 2  ;;  %v2678_v16 = vmax.f32 %v2676_v26, %v2677_v23  ;;  %v2685_v24 = vmax.f32 %v2683_v10, %v2684_v48 }
 0x217   : > { %3003 = vst.msk [vmem:[%s4679_s16 + $0x18] sm:$0xff] %vm1044_vm3, %v2963_v0  ;;  %v2691_v9 = vrot.slane %v2690_v3, 4  ;;  %v2232_v58 = vcombine.high %v2230_v49, %v2230_v49  ;;  %v2641_v14 = vsel %vm2416_vm6, %v2223_v19, -inf  ;;  %v2648_v45 = vsel %vm2416_vm6, %v2231_v51, -inf }
 0x218   : > { %v2673_v15 = vmax.f32 %v2671_v33, %v2672_v54  ;;  %v2679_v52 = vrot.slane %v2678_v16, 2  ;;  %v2686_v1 = vrot.slane %v2685_v24, 2  ;;  %v2642_v21 = vrot.slane %v2641_v14, 4 }
 0x219   : > { %v2692_v38 = vmax.f32 %v2690_v3, %v2691_v9  ;;  %v2649_v12 = vrot.slane %v2648_v45, 4  ;;  %v2655_v36 = vsel %vm2416_vm6, %v2230_v49, -inf  ;;  %v2662_v63 = vsel %vm2416_vm6, %v2232_v58, -inf }
 0x21a   : > { %v2674_v11 = vrot.slane %v2673_v15, 1  ;;  %v2680_v17 = vmax.f32 %v2678_v16, %v2679_v52  ;;  %v2687_v41 = vmax.f32 %v2685_v24, %v2686_v1  ;;  %v2643_v2 = vmax.f32 %v2641_v14, %v2642_v21 }
 0x21b   : > { %v2693_v56 = vrot.slane %v2692_v38, 2  ;;  %v2650_v55 = vmax.f32 %v2648_v45, %v2649_v12  ;;  %v2656_v30 = vrot.slane %v2655_v36, 4  ;;  %v2663_v25 = vrot.slane %v2662_v63, 4 }
 0x21c   : > { %v2681_v59 = vrot.slane %v2680_v17, 1  ;;  %v2644_v13 = vrot.slane %v2643_v2, 2  ;;  %v2005_v46 = vmax.f32 %v4851_v32, 0.0  ;;  %v2675_v26 = vmax.f32 %v2673_v15, %v2674_v11  ;;  %v4879_v32 = vld [vmem:[%s5064_s4] ss:$0 sm:$0xff] }
 0x21d   : > { %v2694_v40 = vmax.f32 %v2692_v38, %v2693_v56  ;;  %v2651_v19 = vrot.slane %v2650_v55, 2  ;;  %v2657_v29 = vmax.f32 %v2655_v36, %v2656_v30  ;;  %v2664_v35 = vmax.f32 %v2662_v63, %v2663_v25 }
 0x21e   : > { %v2688_v10 = vrot.slane %v2687_v41, 1  ;;  %v2645_v62 = vmax.f32 %v2643_v2, %v2644_v13  ;;  %v1972_v33 = vadd.f32 %v4837_v8, %v4575_v34  ;;  %v2682_v23 = vmax.f32 %v2680_v17, %v2681_v59 }
 0x21f   : > { %v2652_v48 = vmax.f32 %v2650_v55, %v2651_v19  ;;  %v2658_v39 = vrot.slane %v2657_v29, 2  ;;  %v2665_v3 = vrot.slane %v2664_v35, 2  ;;  %v2049_v51 = vsel %vm1044_vm3, %v2005_v46, -inf }
 0x220   : > { %v2646_v49 = vrot.slane %v2645_v62, 1  ;;  %v1975_v0 = vadd.f32 %v4879_v32, %v4843_v50  ;;  %v3580_v54 = vadd.f32 %v4691_v43, %v4800_v57  ;;  %v2695_v16 = vrot.slane %v2694_v40, 1 }
 0x221   : > { %v2653_v34 = vrot.slane %v2652_v48, 1  ;;  %v2659_v8 = vmax.f32 %v2657_v29, %v2658_v39  ;;  %v2666_v24 = vmax.f32 %v2664_v35, %v2665_v3  ;;  %v2004_v58 = vmax.f32 %v1972_v33, 0.0 }
 0x222   : > { %v2647_v9 = vmax.f32 %v2645_v62, %v2646_v49  ;;  %v2007_v14 = vmax.f32 %v1975_v0, 0.0  ;;  %v1974_v45 = vadd.f32 %v4879_v32, %v3580_v54  ;;  %v3581_v21 = vadd.f32 %v4702_v6, %v4808_v53 }
 0x223   : > { %v2654_v15 = vmax.f32 %v2652_v48, %v2653_v34  ;;  %v2660_v52 = vrot.slane %v2659_v8, 1  ;;  %v2667_v1 = vrot.slane %v2666_v24, 1  ;;  %v3582_v43 = vadd.f32 %v4711_v28, %v4812_v47 }
 0x224   : > { %v2050_v50 = vsel %vm1044_vm3, %v2007_v14, -inf  ;;  %v2006_v38 = vmax.f32 %v1974_v45, 0.0  ;;  %v3583_v57 = vadd.f32 %v4729_v5, %v4815_v20  ;;  %v2689_v17 = vmax.f32 %v2687_v41, %v2688_v10 }
 0x225   : > { %v2661_v12 = vmax.f32 %v2659_v8, %v2660_v52  ;;  %v2668_v36 = vmax.f32 %v2666_v24, %v2667_v1  ;;  %v2964_v63 = vsel %vm2929_vm7, %v2654_v15, %v2647_v9  ;;  %v2051_v11 = vmax.f32 %v2049_v51, %v2050_v50 }
 0x226   : > { %v2696_v2 = vmax.f32 %v2694_v40, %v2695_v16  ;;  %v2046_v56 = vsel %vm1044_vm3, %v2004_v58, -inf  ;;  %v2047_v6 = vsel %vm1044_vm3, %v2006_v38, -inf  ;;  %v4900_v5 = vadd.f32 %v4879_v32, %v3581_v21 }
 0x227   : > { %v2965_v53 = vsel %vm2931_vm8, %v2661_v12, %v2964_v63  ;;  %v2267_v55 = vcombine.high %v2051_v11, %v2051_v11  ;;  %v2274_v30 = vrot.slane %v2051_v11, %v4585_v61  ;;  %v2048_v28 = vmax.f32 %v2046_v56, %v2047_v6 }
 0x228   : > { %v2966_v47 = vsel %vm2933_vm9, %v2668_v36, %v2965_v53  ;;  %v4903_v20 = vadd.f32 %v4879_v32, %v3582_v43  ;;  %v4906_v41 = vadd.f32 %v4879_v32, %v3583_v57 }
 0x229   : > { %v2967_v25 = vsel %vm2935_vm10, %v2675_v26, %v2966_v47  ;;  %v2281_v59 = vrot.slane %v2267_v55, %v4585_v61  ;;  %v2282_v13 = vcombine.high %v2274_v30, %v2274_v30  ;;  %v2725_v46 = vsel %vm2416_vm6, %v2274_v30, -inf }
 0x22a   : > { %v2968_v40 = vsel %vm2937_vm11, %v2682_v23, %v2967_v25  ;;  %v2726_v19 = vrot.slane %v2725_v46, 4  ;;  %v2250_v29 = vcombine.high %v2048_v28, %v2048_v28  ;;  %v2257_v35 = vrot.slane %v2048_v28, %v4585_v61 }
 0x22b   : > { %v2969_v10 = vsel %vm2939_vm12, %v2689_v17, %v2968_v40  ;;  %v2283_v62 = vcombine.high %v2281_v59, %v2281_v59  ;;  %v2732_v33 = vsel %vm2416_vm6, %v2282_v13, -inf  ;;  %v2739_v48 = vsel %vm2416_vm6, %v2281_v59, -inf }
 0x22c   : > { %v2970_v26 = vsel %vm2941_vm13, %v2696_v2, %v2969_v10  ;;  %v2727_v39 = vmax.f32 %v2725_v46, %v2726_v19  ;;  %v2733_v3 = vrot.slane %v2732_v33, 4  ;;  %v2740_v49 = vrot.slane %v2739_v48, 4 }
 0x22d   : > { %3004 = vst.msk [vmem:[%s4679_s16 + $0x20] sm:$0xff] %vm1044_vm3, %v2970_v26  ;;  %v2746_v23 = vsel %vm2416_vm6, %v2283_v62, -inf  ;;  %v2264_v51 = vrot.slane %v2250_v29, %v4585_v61  ;;  %v2265_v0 = vcombine.high %v2257_v35, %v2257_v35  ;;  %v2697_v54 = vsel %vm2416_vm6, %v2257_v35, -inf }
 0x22e   : > { %v2728_v16 = vrot.slane %v2727_v39, 2  ;;  %v2734_v34 = vmax.f32 %v2732_v33, %v2733_v3  ;;  %v2741_v8 = vmax.f32 %v2739_v48, %v2740_v49  ;;  %v2747_v24 = vrot.slane %v2746_v23, 4 }
 0x22f   : > { %v2266_v9 = vcombine.high %v2264_v51, %v2264_v51  ;;  %v2698_v58 = vrot.slane %v2697_v54, 4  ;;  %v2704_v14 = vsel %vm2416_vm6, %v2265_v0, -inf  ;;  %v2711_v45 = vsel %vm2416_vm6, %v2264_v51, -inf }
 0x230   : > { %v2729_v15 = vmax.f32 %v2727_v39, %v2728_v16  ;;  %v2735_v52 = vrot.slane %v2734_v34, 2  ;;  %v2742_v1 = vrot.slane %v2741_v8, 2  ;;  %v2748_v21 = vmax.f32 %v2746_v23, %v2747_v24 }
 0x231   : > { %v2699_v50 = vmax.f32 %v2697_v54, %v2698_v58  ;;  %v2705_v38 = vrot.slane %v2704_v14, 4  ;;  %v2712_v43 = vrot.slane %v2711_v45, 4  ;;  %v2718_v57 = vsel %vm2416_vm6, %v2266_v9, -inf }
 0x232   : > { %v2730_v12 = vrot.slane %v2729_v15, 1  ;;  %v2736_v36 = vmax.f32 %v2734_v34, %v2735_v52  ;;  %v2743_v63 = vmax.f32 %v2741_v8, %v2742_v1  ;;  %v2749_v11 = vrot.slane %v2748_v21, 2 }
 0x233   : > { %v2700_v17 = vrot.slane %v2699_v50, 2  ;;  %v2706_v2 = vmax.f32 %v2704_v14, %v2705_v38  ;;  %v2713_v56 = vmax.f32 %v2711_v45, %v2712_v43  ;;  %v2719_v6 = vrot.slane %v2718_v57, 4 }
 0x234   : > { %v2750_v53 = vmax.f32 %v2748_v21, %v2749_v11  ;;  %v2009_v55 = vmax.f32 %v4900_v5, 0.0  ;;  %v2011_v30 = vmax.f32 %v4906_v41, 0.0  ;;  %v2731_v13 = vmax.f32 %v2729_v15, %v2730_v12 }
 0x235   : > { %v2701_v28 = vmax.f32 %v2699_v50, %v2700_v17  ;;  %v2707_v47 = vrot.slane %v2706_v2, 2  ;;  %v2714_v25 = vrot.slane %v2713_v56, 2  ;;  %v2720_v59 = vmax.f32 %v2718_v57, %v2719_v6 }
 0x236   : > { %v2737_v46 = vrot.slane %v2736_v36, 1  ;;  %v2744_v40 = vrot.slane %v2743_v63, 1  ;;  %v2008_v19 = vmax.f32 %v4903_v20, 0.0  ;;  %v2751_v33 = vrot.slane %v2750_v53, 1 }
 0x237   : > { %v2702_v29 = vrot.slane %v2701_v28, 1  ;;  %v2708_v35 = vmax.f32 %v2706_v2, %v2707_v47  ;;  %v2715_v10 = vmax.f32 %v2713_v56, %v2714_v25  ;;  %v2721_v62 = vrot.slane %v2720_v59, 2 }
 0x238   : > { %v2055_v48 = vsel %vm1044_vm3, %v2009_v55, -inf  ;;  %v2056_v5 = vsel %vm1044_vm3, %v2011_v30, -inf  ;;  %v3584_v41 = vadd.f32 %v4734_v60, %v4817_v37  ;;  %v3585_v20 = vadd.f32 %v4747_v18, %v4823_v4 }
 0x239   : > { %v2703_v26 = vmax.f32 %v2701_v28, %v2702_v29  ;;  %v2709_v39 = vrot.slane %v2708_v35, 1  ;;  %v2716_v3 = vrot.slane %v2715_v10, 1  ;;  %v2722_v49 = vmax.f32 %v2720_v59, %v2721_v62 }
 0x23a   : > { %v2057_v23 = vmax.f32 %v2055_v48, %v2056_v5  ;;  %v1978_v51 = vadd.f32 %v4879_v32, %v3584_v41  ;;  %v3586_v0 = vadd.f32 %v4749_v42, %v4825_v44  ;;  %v3587_v8 = vadd.f32 %v4766_v22, %v4839_v27 }
 0x23b   : > { %v2710_v54 = vmax.f32 %v2708_v35, %v2709_v39  ;;  %v2717_v16 = vmax.f32 %v2715_v10, %v2716_v3  ;;  %v2723_v34 = vrot.slane %v2722_v49, 1  ;;  %v2738_v60 = vmax.f32 %v2736_v36, %v2737_v46 }
 0x23c   : > { %v2301_v37 = vcombine.high %v2057_v23, %v2057_v23  ;;  %v2308_v24 = vrot.slane %v2057_v23, %v4585_v61  ;;  %v2010_v9 = vmax.f32 %v1978_v51, 0.0  ;;  %v2745_v58 = vmax.f32 %v2743_v63, %v2744_v40 }
 0x23d   : > { %v2752_v14 = vmax.f32 %v2750_v53, %v2751_v33  ;;  %v2724_v45 = vmax.f32 %v2722_v49, %v2723_v34  ;;  %v2971_v15 = vsel %vm2929_vm7, %v2710_v54, %v2703_v26  ;;  %v2052_v22 = vsel %vm1044_vm3, %v2008_v19, -inf }
 0x23e   : > { %v2972_v18 = vsel %vm2931_vm8, %v2717_v16, %v2971_v15  ;;  %v2315_v42 = vrot.slane %v2301_v37, %v4585_v61  ;;  %v2316_v4 = vcombine.high %v2308_v24, %v2308_v24  ;;  %v2781_v44 = vsel %vm2416_vm6, %v2308_v24, -inf }
 0x23f   : > { %v2973_v52 = vsel %vm2933_vm9, %v2724_v45, %v2972_v18  ;;  %v2782_v27 = vrot.slane %v2781_v44, 4  ;;  %v2053_v1 = vsel %vm1044_vm3, %v2010_v9, -inf  ;;  %v1981_v63 = vadd.f32 %v4879_v32, %v3585_v20 }
 0x240   : > { %v2974_v21 = vsel %vm2935_vm10, %v2731_v13, %v2973_v52  ;;  %v2317_v50 = vcombine.high %v2315_v42, %v2315_v42  ;;  %v2788_v38 = vsel %vm2416_vm6, %v2316_v4, -inf  ;;  %v2795_v43 = vsel %vm2416_vm6, %v2315_v42, -inf }
 0x241   : > { %v2975_v57 = vsel %vm2937_vm11, %v2738_v60, %v2974_v21  ;;  %v2789_v12 = vrot.slane %v2788_v38, 4  ;;  %v2796_v36 = vrot.slane %v2795_v43, 4  ;;  %v2783_v17 = vmax.f32 %v2781_v44, %v2782_v27 }
 0x242   : > { %v2976_v11 = vsel %vm2939_vm12, %v2745_v58, %v2975_v57  ;;  %v2802_v2 = vsel %vm2416_vm6, %v2317_v50, -inf  ;;  %v2054_v56 = vmax.f32 %v2052_v22, %v2053_v1  ;;  %v2013_v25 = vmax.f32 %v1981_v63, 0.0 }
 0x243   : > { %v2977_v6 = vsel %vm2941_vm13, %v2752_v14, %v2976_v11  ;;  %v2790_v53 = vmax.f32 %v2788_v38, %v2789_v12  ;;  %v2797_v55 = vmax.f32 %v2795_v43, %v2796_v36  ;;  %v2803_v30 = vrot.slane %v2802_v2, 4 }
 0x244   : > { %3005 = vst.msk [vmem:[%s4679_s16 + $0x28] sm:$0xff] %vm1044_vm3, %v2977_v6  ;;  %v2284_v28 = vcombine.high %v2054_v56, %v2054_v56  ;;  %v2291_v47 = vrot.slane %v2054_v56, %v4585_v61  ;;  %v1983_v59 = vadd.f32 %v4879_v32, %v3587_v8  ;;  %v2784_v13 = vrot.slane %v2783_v17, 2 }
 0x245   : > { %v2791_v29 = vrot.slane %v2790_v53, 2  ;;  %v2798_v35 = vrot.slane %v2797_v55, 2  ;;  %v1980_v62 = vadd.f32 %v4879_v32, %v3586_v0  ;;  %v2804_v33 = vmax.f32 %v2802_v2, %v2803_v30 }
 0x246   : > { %v2298_v46 = vrot.slane %v2284_v28, %v4585_v61  ;;  %v2299_v40 = vcombine.high %v2291_v47, %v2291_v47  ;;  %v2753_v19 = vsel %vm2416_vm6, %v2291_v47, -inf  ;;  %v2061_v39 = vsel %vm1044_vm3, %v2013_v25, -inf }
 0x247   : > { %v2754_v10 = vrot.slane %v2753_v19, 4  ;;  %v2015_v3 = vmax.f32 %v1983_v59, 0.0  ;;  %v2785_v49 = vmax.f32 %v2783_v17, %v2784_v13  ;;  %v2792_v54 = vmax.f32 %v2790_v53, %v2791_v29 }
 0x248   : > { %v2300_v48 = vcombine.high %v2298_v46, %v2298_v46  ;;  %v2760_v5 = vsel %vm2416_vm6, %v2299_v40, -inf  ;;  %v2767_v41 = vsel %vm2416_vm6, %v2298_v46, -inf  ;;  %v2012_v8 = vmax.f32 %v1980_v62, 0.0 }
 0x249   : > { %v2755_v26 = vmax.f32 %v2753_v19, %v2754_v10  ;;  %v2761_v23 = vrot.slane %v2760_v5, 4  ;;  %v2768_v51 = vrot.slane %v2767_v41, 4  ;;  %v2799_v0 = vmax.f32 %v2797_v55, %v2798_v35 }
 0x24a   : > { %v2774_v20 = vsel %vm2416_vm6, %v2300_v48, -inf  ;;  %v2805_v60 = vrot.slane %v2804_v33, 2  ;;  %v2062_v14 = vsel %vm1044_vm3, %v2015_v3, -inf  ;;  %v3588_v45 = vadd.f32 %v4769_v31, %v4845_v7 }
 0x24b   : > { %v2756_v16 = vrot.slane %v2755_v26, 2  ;;  %v2775_v34 = vrot.slane %v2774_v20, 4  ;;  %v2762_v37 = vmax.f32 %v2760_v5, %v2761_v23  ;;  %v2769_v24 = vmax.f32 %v2767_v41, %v2768_v51 }
 0x24c   : > { %v2786_v15 = vrot.slane %v2785_v49, 1  ;;  %v2063_v4 = vmax.f32 %v2061_v39, %v2062_v14  ;;  %v2793_v44 = vrot.slane %v2792_v54, 1  ;;  %v1982_v27 = vadd.f32 %v4879_v32, %v3588_v45 }
 0x24d   : > { %v2757_v9 = vmax.f32 %v2755_v26, %v2756_v16  ;;  %v2776_v58 = vmax.f32 %v2774_v20, %v2775_v34  ;;  %v2763_v18 = vrot.slane %v2762_v37, 2  ;;  %v2770_v42 = vrot.slane %v2769_v24, 2 }
 0x24e   : > { %v2335_v50 = vcombine.high %v2063_v4, %v2063_v4  ;;  %v2342_v38 = vrot.slane %v2063_v4, %v4585_v61  ;;  %v2800_v43 = vrot.slane %v2799_v0, 1  ;;  %v2806_v57 = vmax.f32 %v2804_v33, %v2805_v60 }
 0x24f   : > { %v2758_v52 = vrot.slane %v2757_v9, 1  ;;  %v2777_v22 = vrot.slane %v2776_v58, 2  ;;  %v2764_v1 = vmax.f32 %v2762_v37, %v2763_v18  ;;  %v2771_v21 = vmax.f32 %v2769_v24, %v2770_v42 }
 0x250   : > { %v2014_v36 = vmax.f32 %v1982_v27, 0.0  ;;  %v2349_v7 = vrot.slane %v2335_v50, %v4585_v61  ;;  %v2350_v11 = vcombine.high %v2342_v38, %v2342_v38  ;;  %v2058_v2 = vsel %vm1044_vm3, %v2012_v8, -inf }
 0x251   : > { %v2778_v12 = vmax.f32 %v2776_v58, %v2777_v22  ;;  %v2765_v63 = vrot.slane %v2764_v1, 1  ;;  %v2772_v31 = vrot.slane %v2771_v21, 1  ;;  %v2837_v56 = vsel %vm2416_vm6, %v2342_v38, -inf }
 0x252   : > { %v2059_v32 = vsel %vm1044_vm3, %v2014_v36, -inf  ;;  %v2759_v6 = vmax.f32 %v2757_v9, %v2758_v52  ;;  %v2351_v30 = vcombine.high %v2349_v7, %v2349_v7  ;;  %v2787_v28 = vmax.f32 %v2785_v49, %v2786_v15 }
 0x253   : > { %v2779_v17 = vrot.slane %v2778_v12, 1  ;;  %v2766_v53 = vmax.f32 %v2764_v1, %v2765_v63  ;;  %v2773_v55 = vmax.f32 %v2771_v21, %v2772_v31  ;;  %v2844_v25 = vsel %vm2416_vm6, %v2350_v11, -inf }
 0x254   : > { %v2060_v59 = vmax.f32 %v2058_v2, %v2059_v32  ;;  %v2807_v13 = vrot.slane %v2806_v57, 1  ;;  %v2838_v40 = vrot.slane %v2837_v56, 4  ;;  %v2851_v19 = vsel %vm2416_vm6, %v2349_v7, -inf }
 0x255   : > { %v2780_v47 = vmax.f32 %v2778_v12, %v2779_v17  ;;  %v2978_v46 = vsel %vm2929_vm7, %v2766_v53, %v2759_v6  ;;  %v2858_v35 = vsel %vm2416_vm6, %v2351_v30, -inf  ;;  %v2794_v33 = vmax.f32 %v2792_v54, %v2793_v44 }
 0x256   : > { %v2979_v29 = vsel %vm2931_vm8, %v2773_v55, %v2978_v46  ;;  %v2318_v10 = vcombine.high %v2060_v59, %v2060_v59  ;;  %v2325_v62 = vrot.slane %v2060_v59, %v4585_v61  ;;  %v2801_v48 = vmax.f32 %v2799_v0, %v2800_v43 }
 0x257   : > { %v2980_v5 = vsel %vm2933_vm9, %v2780_v47, %v2979_v29  ;;  %v2845_v41 = vrot.slane %v2844_v25, 4  ;;  %v2852_v39 = vrot.slane %v2851_v19, 4  ;;  %v2808_v23 = vmax.f32 %v2806_v57, %v2807_v13 }
 0x258   : > { %v2981_v26 = vsel %vm2935_vm10, %v2787_v28, %v2980_v5  ;;  %v2332_v3 = vrot.slane %v2318_v10, %v4585_v61  ;;  %v2333_v49 = vcombine.high %v2325_v62, %v2325_v62  ;;  %v2859_v20 = vrot.slane %v2858_v35, 4 }
 0x259   : > { %v2982_v51 = vsel %vm2937_vm11, %v2794_v33, %v2981_v26  ;;  %v2839_v34 = vmax.f32 %v2837_v56, %v2838_v40  ;;  %v2809_v54 = vsel %vm2416_vm6, %v2325_v62, -inf  ;;  %v2846_v60 = vmax.f32 %v2844_v25, %v2845_v41 }
 0x25a   : > { %v2983_v16 = vsel %vm2939_vm12, %v2801_v48, %v2982_v51  ;;  %v2334_v8 = vcombine.high %v2332_v3, %v2332_v3  ;;  %v2853_v37 = vmax.f32 %v2851_v19, %v2852_v39  ;;  %v2810_v24 = vrot.slane %v2809_v54, 4 }
 0x25b   : > { %v2984_v0 = vsel %vm2941_vm13, %v2808_v23, %v2983_v16  ;;  %v2816_v61 = vsel %vm2416_vm6, %v2333_v49, -inf  ;;  %v2823_v9 = vsel %vm2416_vm6, %v2332_v3, -inf  ;;  %v2860_v58 = vmax.f32 %v2858_v35, %v2859_v20 }
 0x25c   : > { %3006 = vst.msk [vmem:[%s4679_s16 + $0x30] sm:$0xff] %vm1044_vm3, %v2984_v0  ;;  %v2817_v14 = vrot.slane %v2816_v61, 4  ;;  %v2840_v45 = vrot.slane %v2839_v34, 2  ;;  %v2811_v15 = vmax.f32 %v2809_v54, %v2810_v24  ;;  %v2824_v18 = vrot.slane %v2823_v9, 4 }
 0x25d   : > { %v2830_v42 = vsel %vm2416_vm6, %v2334_v8, -inf  ;;  %v2847_v4 = vrot.slane %v2846_v60, 2  ;;  %v2854_v22 = vrot.slane %v2853_v37, 2  ;;  %v2861_v21 = vrot.slane %v2860_v58, 2 }
 0x25e   : > { %v2818_v44 = vmax.f32 %v2816_v61, %v2817_v14  ;;  %v2831_v52 = vrot.slane %v2830_v42, 4  ;;  %v2812_v27 = vrot.slane %v2811_v15, 2  ;;  %v2825_v1 = vmax.f32 %v2823_v9, %v2824_v18 }
 0x25f   : > { %v2841_v43 = vmax.f32 %v2839_v34, %v2840_v45  ;;  %v2848_v36 = vmax.f32 %v2846_v60, %v2847_v4  ;;  %v2855_v7 = vmax.f32 %v2853_v37, %v2854_v22  ;;  %v2862_v2 = vmax.f32 %v2860_v58, %v2861_v21 }
 0x260   : > { %v2819_v50 = vrot.slane %v2818_v44, 2  ;;  %v2832_v38 = vmax.f32 %v2830_v42, %v2831_v52  ;;  %v2813_v57 = vmax.f32 %v2811_v15, %v2812_v27  ;;  %v2826_v12 = vrot.slane %v2825_v1, 2 }
 0x261   : > { %v2842_v6 = vrot.slane %v2841_v43, 1  ;;  %v2849_v55 = vrot.slane %v2848_v36, 1  ;;  %v2856_v25 = vrot.slane %v2855_v7, 1  ;;  %v2863_v13 = vrot.slane %v2862_v2, 1 }
 0x262   : > { %v2820_v63 = vmax.f32 %v2818_v44, %v2819_v50  ;;  %v2833_v31 = vrot.slane %v2832_v38, 2  ;;  %v2814_v11 = vrot.slane %v2813_v57, 1  ;;  %v2827_v17 = vmax.f32 %v2825_v1, %v2826_v12 }
 0x263   : > { %v2843_v19 = vmax.f32 %v2841_v43, %v2842_v6  ;;  %v2850_v35 = vmax.f32 %v2848_v36, %v2849_v55  ;;  %v2857_v62 = vmax.f32 %v2855_v7, %v2856_v25  ;;  %v2864_v48 = vmax.f32 %v2862_v2, %v2863_v13 }
 0x264   : > { %v2821_v56 = vrot.slane %v2820_v63, 1  ;;  %v2834_v32 = vmax.f32 %v2832_v38, %v2833_v31  ;;  %v2828_v53 = vrot.slane %v2827_v17, 1  ;;  %v2815_v30 = vmax.f32 %v2813_v57, %v2814_v11 }
 0x266   : > { %v2822_v28 = vmax.f32 %v2820_v63, %v2821_v56  ;;  %v2835_v47 = vrot.slane %v2834_v32, 1  ;;  %v2829_v59 = vmax.f32 %v2827_v17, %v2828_v53 }
 0x268   : > { %v2836_v46 = vmax.f32 %v2834_v32, %v2835_v47  ;;  %v2985_v40 = vsel %vm2929_vm7, %v2822_v28, %v2815_v30 }
 0x269   : > { %v2986_v29 = vsel %vm2931_vm8, %v2829_v59, %v2985_v40 }
 0x26a   : > { %v2987_v10 = vsel %vm2933_vm9, %v2836_v46, %v2986_v29 }
 0x26b   : > { %v2988_v33 = vsel %vm2935_vm10, %v2843_v19, %v2987_v10 }
 0x26c   : > { %v2989_v5 = vsel %vm2937_vm11, %v2850_v35, %v2988_v33 }
 0x26d   : > { %v2990_v41 = vsel %vm2939_vm12, %v2857_v62, %v2989_v5 }
 0x26e   : > { %v2991_v26 = vsel %vm2941_vm13, %v2864_v48, %v2990_v41 }
 0x26f   : > { %3007 = vst.msk [vmem:[%s4679_s16 + $0x38] sm:$0xff] %vm1044_vm3, %v2991_v26 }
 0x270   : > { %3694 = shalt.err (!%p3691_p5)
}
 0x271   : > { %s3695_s13 = scalar_lea.hbm %s5003_s12, 1024  ;;  %s3699_s17 = scalar_lea.hbm %s5065_s5, 2048 }
 0x272   : > { %p3696_p6 = scmp.ne.s32.totalorder %s5003_s12, %s3695_s13  ;;  %p3700_p10 = scmp.lt.u32.totalorder %s5003_s12, %s5065_s5 }
 0x273   : > { %p3701_p11 = scmp.lt.u32.totalorder %s3699_s17, %s3695_s13  ;;  %p3703_p13 = scmp.lt.u32.totalorder %s3695_s13, %s5003_s12 }
 0x274   : > { %p3697_p7 = pnand %p3696_p6, %p3836_p4 }
 0x275   : > { %p3702_p12 = por %p3701_p11, %p3700_p10 }
 0x276   : > { %p3698_p9 = pneg %p3697_p7 }
 0x277   : > { %p3704_p0 = por %p3703_p13, %p3702_p12 }
 0x279   : > { %p3705_p1 = pnand %p3704_p0, %p3698_p9 }
 0x27b   : > { %3708 = shalt.err (!%p3705_p1)
}
 0x27c   : > { %s3765_s8 = smov 128  }
 0x27d   : > { %3621 = dma.vmem_to_hbm [thread:$0]  (%p3836_p4), %s5006_s7, 1024, %s5003_s12, %s5013_s21, %s3765_s8, %s3765_s8, %s3761_s25  }
 0x27e PF: > { %p3627_p2 = scmp.ge.s32.totalorder %s3759_s23, 2  ;;  %s3039_s15 = sand.u32 1, %s3739_s18  }
 0x27f   : > { %s3040_s9 = scalar_lea.sflag [#allocation3], %s3039_s15 }
 0x280   : > { %p3624_p3 = pnand %p3627_p2, %p3843_p8 }
 0x282   : > { %3734 = dma.done.wait (!%p3624_p3), %s3040_s9, 1024  }
 0x283   : > { %3736 = vsyncadd (!%p3624_p3), %s3040_s9, 4294966272  ;;  %s18_s23 = sadd.s32 1, %s3759_s23   ;;  %s5068_s18 = smov %s3743_s19 }
 0x284   : > { %p15_p5 = scmp.ge.s32.totalorder %s18_s23, 4   ;;  %s5069_s19 = smov %s3747_s20 }
 0x285   : > { %s5070_s20 = smov %s3849_s6  ;;  %s5071_s21 = smov %s3755_s22 }
 0x286   : > { %s5072_s22 = smov %s5074_s26  ;;  %17 = sbr.rel (!%p15_p5) target bundleno = 4 (0x4), region = 83 }
 0x28d   :  { %3045 = vsyncpa [#allocation3], 1 }
 0x28e   :  { %3047 = vsyncpa [#allocation3 + $0x1], 1 }

</bundles_post_ra>
